<compile_context>
chip_gen: v7x
topology: tpu7x:2x2x1
jax: 0.10.0
libtpu: 0.0.40
codegen_flags: <defaults>
</compile_context>

<pallas_src>
import functools
import math

import numpy as np
import jax
import jax.numpy as jnp
from jax.experimental import pallas as pl
from jax.experimental.pallas import tpu as pltpu

# ---------------- synthetic config (RobertaConfig analogue, small) ----------------
VOCAB = 128
HIDDEN = 256            # 2 x 128 lanes -> lane-dense activations
NUM_HEADS = 2
HEAD_DIM = HIDDEN // NUM_HEADS   # 128 -> per-head slices are vreg-lane aligned
INTERMEDIATE = 512
NUM_LAYERS = 2
NUM_LABELS = 3
CLS_PAD = 128           # lane-dense padded width for the classifier out_proj
MAX_POS = 64
TYPE_VOCAB = 2
PAD_ID = 1              # Roberta pad_token_id / padding_idx
EPS = 1e-5


# ============================ Pallas kernels ============================

def _layernorm_f32(x, g, b):
    mean = jnp.mean(x, axis=-1, keepdims=True)
    var = jnp.mean((x - mean) ** 2, axis=-1, keepdims=True)
    return (x - mean) * jax.lax.rsqrt(var + EPS) * g + b


def _encoder_kernel(x0_ref, segq_ref, segk_ref, embg_ref, embb_ref,
                    qkv_w_ref, qkv_b_ref,
                    ao_w_ref, ao_b_ref, ln1_g_ref, ln1_b_ref,
                    in_w_ref, in_b_ref,
                    out_w_ref, out_b_ref, ln2_g_ref, ln2_b_ref,
                    o_ref, h_ref, mask_ref,
                    *, num_heads, head_dim, scale):
    """grid=(NUM_LAYERS,): embedding LN on step 0, one BertLayer per grid step.

    The [T, H] hidden state lives in the f32 VMEM scratch `h_ref` for the whole
    encoder; the additive block-diagonal mask lives in `mask_ref`.
    """
    layer = pl.program_id(0)

    @pl.when(layer == 0)
    def _init():
        # RobertaEmbedding tail: LayerNorm(word + position + token_type)
        x0 = x0_ref[...].astype(jnp.float32)
        h_ref[...] = _layernorm_f32(x0, embg_ref[...], embb_ref[...])
        # block-diagonal mask built once from O(T) segment-id vectors
        # TODO(synk): padding tokens remain attendable (matches vLLM encoder attention
        # over flattened sequences); an HF-style padding attention_mask would mask them.
        same_seq = segq_ref[...] == segk_ref[...]            # [T, T] bool
        mask_ref[...] = jnp.where(same_seq, 0.0, -1e30).astype(jnp.float32)

    x = h_ref[...]                                           # [T, H] f32 residual
    xb = x.astype(jnp.bfloat16)
    hidden = x.shape[1]

    # ---- fused QKV projection (bf16 MXU operands, f32 accumulation) ----
    qkv = jnp.dot(xb, qkv_w_ref[...],
                  preferred_element_type=jnp.float32) + qkv_b_ref[...]
    q = qkv[:, :hidden]                  # splits at 256/512 -> lane aligned
    k = qkv[:, hidden:2 * hidden]
    v = qkv[:, 2 * hidden:]

    # ---- self-attention; HEAD_DIM=128 so every slice / concat is a clean vreg view ----
    ctx_heads = []
    for h in range(num_heads):           # unrolled at trace time
        sl = slice(h * head_dim, (h + 1) * head_dim)         # multiples of 128
        qh = q[:, sl].astype(jnp.bfloat16)
        kh = k[:, sl].astype(jnp.bfloat16)
        vh = v[:, sl].astype(jnp.bfloat16)
        s = jax.lax.dot_general(qh, kh, (((1,), (1,)), ((), ())),
                                preferred_element_type=jnp.float32) * scale
        s = s + mask_ref[...]                                # f32 mask math
        m = jnp.max(s, axis=-1, keepdims=True)
        p = jnp.exp(s - m)
        p = p * pl.reciprocal(jnp.sum(p, axis=-1, keepdims=True), approx=True)
        ctx_heads.append(jnp.dot(p.astype(jnp.bfloat16), vh,
                                 preferred_element_type=jnp.float32))
    ctx = jnp.concatenate(ctx_heads, axis=-1)                # [T, H], 128-aligned blocks

    # ---- attention output dense + residual LayerNorm ----
    attn_out = jnp.dot(ctx.astype(jnp.bfloat16), ao_w_ref[...],
                       preferred_element_type=jnp.float32) + ao_b_ref[...]
    x1 = _layernorm_f32(attn_out + x, ln1_g_ref[...], ln1_b_ref[...])

    # ---- intermediate dense + GELU (tanh approx -> EUP slot; HF reference uses exact erf) ----
    inter = jnp.dot(x1.astype(jnp.bfloat16), in_w_ref[...],
                    preferred_element_type=jnp.float32) + in_b_ref[...]
    inter = jax.nn.gelu(inter, approximate=True)

    # ---- output dense + residual LayerNorm; carry stays in VMEM ----
    out = jnp.dot(inter.astype(jnp.bfloat16), out_w_ref[...],
                  preferred_element_type=jnp.float32) + out_b_ref[...]
    h_new = _layernorm_f32(out + x1, ln2_g_ref[...], ln2_b_ref[...])
    h_ref[...] = h_new

    @pl.when(layer == pl.num_programs(0) - 1)
    def _finalize():
        o_ref[...] = h_new.astype(o_ref.dtype)               # lane-dense bf16 store


def _cls_head_kernel(x_ref, w1_ref, b1_ref, w2_ref, b2_ref, o_ref):
    """RobertaClassificationHead fused: tanh(dense(x)) -> out_proj (lane-padded to 128)."""
    h = jnp.dot(x_ref[...].astype(jnp.bfloat16), w1_ref[...],
                preferred_element_type=jnp.float32) + b1_ref[...]
    h = jnp.tanh(h)
    y = jnp.dot(h.astype(jnp.bfloat16), w2_ref[...],
                preferred_element_type=jnp.float32) + b2_ref[...]
    o_ref[...] = y.astype(o_ref.dtype)


# ============================ kernel wrappers ============================

def roberta_embedding_sum(params, input_ids, position_ids, token_type_ids):
    # Embedding gathers + sum stay in plain JAX (XLA fuses gather+add); the embedding
    # LayerNorm is fused into the encoder kernel (grid step 0).
    word = jnp.take(params["word_emb"], input_ids, axis=0)
    pos = jnp.take(params["pos_emb"], position_ids, axis=0)
    tok = jnp.take(params["type_emb"], token_type_ids, axis=0)
    return word + pos + tok


def roberta_encoder(params, x0, seg_ids):
    T = x0.shape[0]
    H, I, L = HIDDEN, INTERMEDIATE, NUM_LAYERS
    seg_q = seg_ids.reshape(T, 1).astype(jnp.int32)
    seg_k = seg_ids.reshape(1, T).astype(jnp.int32)

    def layer_spec(shape):    # stacked per-layer weight: [L, *shape], squeeze the L axis
        return pl.BlockSpec((None,) + shape, lambda l: (l, 0, 0))

    def const_spec(shape):    # layer-invariant input
        return pl.BlockSpec(shape, lambda l: (0, 0))

    kernel = functools.partial(
        _encoder_kernel, num_heads=NUM_HEADS, head_dim=HEAD_DIM,
        scale=float(1.0 / math.sqrt(HEAD_DIM)))

    grid_spec = pltpu.PrefetchScalarGridSpec(
        num_scalar_prefetch=0,
        grid=(L,),
        in_specs=[
            const_spec((T, H)),          # summed embeddings
            const_spec((T, 1)),          # seg_q
            const_spec((1, T)),          # seg_k
            const_spec((1, H)),          # emb_ln_g
            const_spec((1, H)),          # emb_ln_b
            layer_spec((H, 3 * H)),      # qkv_w
            layer_spec((1, 3 * H)),      # qkv_b
            layer_spec((H, H)),          # attn_out_w
            layer_spec((1, H)),          # attn_out_b
            layer_spec((1, H)),          # ln1_g
            layer_spec((1, H)),          # ln1_b
            layer_spec((H, I)),          # inter_w
            layer_spec((1, I)),          # inter_b
            layer_spec((I, H)),          # out_w
            layer_spec((1, H)),          # out_b
            layer_spec((1, H)),          # ln2_g
            layer_spec((1, H)),          # ln2_b
        ],
        out_specs=pl.BlockSpec((T, H), lambda l: (0, 0)),     # resident across layers
        scratch_shapes=[
            pltpu.VMEM((T, H), jnp.float32),    # hidden carry
            pltpu.VMEM((T, T), jnp.float32),    # additive block-diagonal mask
        ],
    )

    return pl.pallas_call(
        kernel,
        out_shape=jax.ShapeDtypeStruct((T, H), jnp.bfloat16),
        grid_spec=grid_spec,
        compiler_params=pltpu.CompilerParams(dimension_semantics=("arbitrary",)),
    )(x0, seg_q, seg_k, params["emb_ln_g"], params["emb_ln_b"],
      params["qkv_w"], params["qkv_b"],
      params["attn_out_w"], params["attn_out_b"], params["ln1_g"], params["ln1_b"],
      params["inter_w"], params["inter_b"],
      params["out_w"], params["out_b"], params["ln2_g"], params["ln2_b"])


def classification_head(cls_tokens, params):
    padded = pl.pallas_call(
        _cls_head_kernel,
        out_shape=jax.ShapeDtypeStruct((cls_tokens.shape[0], CLS_PAD), jnp.float32),
    )(cls_tokens, params["cls_dense_w"], params["cls_dense_b"],
      params["cls_out_w_pad"], params["cls_out_b_pad"])
    return padded[:, :NUM_LABELS]          # slice the lane-padded logits outside


# ============================ model glue ============================

def create_position_ids_from_input_ids(input_ids_np, padding_idx):
    # mirrors the fairseq-style helper (per sequence, cumsum over dim 0)
    mask = (input_ids_np != padding_idx).astype(np.int64)
    incremental = np.cumsum(mask, axis=0) * mask
    return incremental + padding_idx


def init_params(key):
    keys = iter(jax.random.split(key, 32))

    def nrm_bf16(shape):
        return (0.02 * jax.random.normal(next(keys), shape, dtype=jnp.float32)).astype(jnp.bfloat16)

    def nrm_f32(shape):
        return 0.02 * jax.random.normal(next(keys), shape, dtype=jnp.float32)

    L, H, I = NUM_LAYERS, HIDDEN, INTERMEDIATE
    p = {
        "word_emb": nrm_f32((VOCAB, H)),
        "pos_emb": nrm_f32((MAX_POS, H)),
        "type_emb": nrm_f32((TYPE_VOCAB, H)),
        "emb_ln_g": jnp.ones((1, H), jnp.float32),
        "emb_ln_b": jnp.zeros((1, H), jnp.float32),
        # per-layer weights stacked on a leading [L, ...] axis for the layer-grid pipeline
        "qkv_w": nrm_bf16((L, H, 3 * H)),
        "qkv_b": jnp.zeros((L, 1, 3 * H), jnp.float32),
        "attn_out_w": nrm_bf16((L, H, H)),
        "attn_out_b": jnp.zeros((L, 1, H), jnp.float32),
        "ln1_g": jnp.ones((L, 1, H), jnp.float32),
        "ln1_b": jnp.zeros((L, 1, H), jnp.float32),
        "inter_w": nrm_bf16((L, H, I)),
        "inter_b": jnp.zeros((L, 1, I), jnp.float32),
        "out_w": nrm_bf16((L, I, H)),
        "out_b": jnp.zeros((L, 1, H), jnp.float32),
        "ln2_g": jnp.ones((L, 1, H), jnp.float32),
        "ln2_b": jnp.zeros((L, 1, H), jnp.float32),
        # RobertaClassificationHead (dense + tanh + out_proj, out_proj lane-padded)
        "cls_dense_w": nrm_bf16((H, H)),
        "cls_dense_b": jnp.zeros((1, H), jnp.float32),
    }
    out_w = nrm_bf16((H, NUM_LABELS))
    p["cls_out_w_pad"] = jnp.zeros((H, CLS_PAD), jnp.bfloat16).at[:, :NUM_LABELS].set(out_w)
    p["cls_out_b_pad"] = jnp.zeros((1, CLS_PAD), jnp.float32)
    return p


def roberta_forward(params, input_ids, position_ids, token_type_ids, seg_ids, cls_indices):
    # BertModel with RobertaEmbedding (embedding LN + all layers fused in one pallas_call)
    x0 = roberta_embedding_sum(params, input_ids, position_ids, token_type_ids)
    hidden = roberta_encoder(params, x0, seg_ids)
    # ClassifierPooler: CLSPool -> RobertaClassificationHead (dense + tanh, out_proj)
    cls = jnp.take(hidden, cls_indices, axis=0)
    logits = classification_head(cls, params)
    # TODO(synk): ClassifierPooler.act_fn (softmax/sigmoid head activation) is a
    # serving-time detail of DispatchPooler, not part of the classification head forward.
    return hidden, logits


# ============================ main ============================

if __name__ == "__main__":
    key = jax.random.PRNGKey(0)
    pkey, dkey = jax.random.split(key)
    params = init_params(pkey)

    # Two sequences of length 8, flattened vLLM-style to a single token axis.
    seq_lens = [8, 8]
    T = sum(seq_lens)
    ids_np = np.array(jax.random.randint(dkey, (T,), 2, VOCAB), dtype=np.int64)
    ids_np[6] = PAD_ID   # exercise the padding-aware position ids
    ids_np[15] = PAD_ID

    # Roberta position ids (per sequence), as RobertaEmbedding.forward recomputes them.
    pos_list, seg_list = [], []
    off = 0
    for s, L in enumerate(seq_lens):
        pos_list.append(create_position_ids_from_input_ids(ids_np[off:off + L], PAD_ID))
        seg_list.extend([s] * L)
        off += L
    position_ids_np = np.concatenate(pos_list)
    seg_ids_np = np.array(seg_list, dtype=np.int32)

    cls_indices_np = np.array([0] + list(np.cumsum(seq_lens)[:-1]), dtype=np.int32)

    input_ids = jnp.asarray(ids_np, dtype=jnp.int32)
    position_ids = jnp.asarray(position_ids_np, dtype=jnp.int32)
    token_type_ids = jnp.zeros((T,), dtype=jnp.int32)
    seg_ids = jnp.asarray(seg_ids_np)
    cls_indices = jnp.asarray(cls_indices_np)

    hidden, logits = roberta_forward(
        params, input_ids, position_ids, token_type_ids, seg_ids, cls_indices)
    jax.block_until_ready(hidden)
    jax.block_until_ready(logits)
    assert hidden.shape == (T, HIDDEN)
    assert logits.shape == (len(seq_lens), NUM_LABELS)
    h32 = hidden.astype(jnp.float32)
    assert bool(jnp.all(jnp.isfinite(h32))) and bool(jnp.all(jnp.isfinite(logits)))
    print("KERNEL_OK")
</pallas_src>

<mosaic_0001>
module attributes {stable_mosaic.version = 11 : i64} {
  func.func @_encoder_kernel(%arg0: i32, %arg1: memref<16x256xf32, #tpu.memory_space<vmem>>, %arg2: memref<16x1xi32, #tpu.memory_space<vmem>>, %arg3: memref<1x16xi32, #tpu.memory_space<vmem>>, %arg4: memref<1x256xf32, #tpu.memory_space<vmem>>, %arg5: memref<1x256xf32, #tpu.memory_space<vmem>>, %arg6: memref<1x256x768xbf16, #tpu.memory_space<vmem>>, %arg7: memref<1x1x768xf32, #tpu.memory_space<vmem>>, %arg8: memref<1x256x256xbf16, #tpu.memory_space<vmem>>, %arg9: memref<1x1x256xf32, #tpu.memory_space<vmem>>, %arg10: memref<1x1x256xf32, #tpu.memory_space<vmem>>, %arg11: memref<1x1x256xf32, #tpu.memory_space<vmem>>, %arg12: memref<1x256x512xbf16, #tpu.memory_space<vmem>>, %arg13: memref<1x1x512xf32, #tpu.memory_space<vmem>>, %arg14: memref<1x512x256xbf16, #tpu.memory_space<vmem>>, %arg15: memref<1x1x256xf32, #tpu.memory_space<vmem>>, %arg16: memref<1x1x256xf32, #tpu.memory_space<vmem>>, %arg17: memref<1x1x256xf32, #tpu.memory_space<vmem>>, %arg18: memref<16x256xbf16, #tpu.memory_space<vmem>>, %arg19: memref<16x256xf32, #tpu.memory_space<vmem>>, %arg20: memref<16x16xf32, #tpu.memory_space<vmem>>) attributes {dimension_semantics = [#tpu.dimension_semantics<arbitrary>], iteration_bounds = array<i64: 2>, scalar_prefetch = 0 : i64, scratch_operands = 2 : i64, tpu.core_type = #tpu.core_type<tc>, window_params = [{pipeline_mode = #tpu.pipeline_mode<synchronous>, transform_indices = @transform_0, window_bounds = array<i64: 16, 256>}, {pipeline_mode = #tpu.pipeline_mode<synchronous>, transform_indices = @transform_1, window_bounds = array<i64: 16, 1>}, {pipeline_mode = #tpu.pipeline_mode<synchronous>, transform_indices = @transform_2, window_bounds = array<i64: 1, 16>}, {pipeline_mode = #tpu.pipeline_mode<synchronous>, transform_indices = @transform_3, window_bounds = array<i64: 1, 256>}, {pipeline_mode = #tpu.pipeline_mode<synchronous>, transform_indices = @transform_4, window_bounds = array<i64: 1, 256>}, {transform_indices = @transform_5, window_bounds = array<i64: 1, 256, 768>}, {transform_indices = @transform_6, window_bounds = array<i64: 1, 1, 768>}, {transform_indices = @transform_7, window_bounds = array<i64: 1, 256, 256>}, {transform_indices = @transform_8, window_bounds = array<i64: 1, 1, 256>}, {transform_indices = @transform_9, window_bounds = array<i64: 1, 1, 256>}, {transform_indices = @transform_10, window_bounds = array<i64: 1, 1, 256>}, {transform_indices = @transform_11, window_bounds = array<i64: 1, 256, 512>}, {transform_indices = @transform_12, window_bounds = array<i64: 1, 1, 512>}, {transform_indices = @transform_13, window_bounds = array<i64: 1, 512, 256>}, {transform_indices = @transform_14, window_bounds = array<i64: 1, 1, 256>}, {transform_indices = @transform_15, window_bounds = array<i64: 1, 1, 256>}, {transform_indices = @transform_16, window_bounds = array<i64: 1, 1, 256>}, {pipeline_mode = #tpu.pipeline_mode<synchronous>, transform_indices = @transform_17, window_bounds = array<i64: 16, 256>}]} {
    %c0_i32 = arith.constant 0 : i32
    %0 = arith.cmpi eq, %arg0, %c0_i32 : i32
    %1 = arith.extui %0 : i1 to i32
    %c0_i32_0 = arith.constant 0 : i32
    %2 = arith.cmpi ne, %1, %c0_i32_0 : i32
    scf.if %2 {
      %c0_72 = arith.constant 0 : index
      %c0_73 = arith.constant 0 : index
      %157 = vector.load %arg1[%c0_72, %c0_73] : memref<16x256xf32, #tpu.memory_space<vmem>>, vector<16x256xf32>
      %c0_74 = arith.constant 0 : index
      %c0_75 = arith.constant 0 : index
      %158 = vector.load %arg4[%c0_74, %c0_75] : memref<1x256xf32, #tpu.memory_space<vmem>>, vector<1x256xf32>
      %c0_76 = arith.constant 0 : index
      %c0_77 = arith.constant 0 : index
      %159 = vector.load %arg5[%c0_76, %c0_77] : memref<1x256xf32, #tpu.memory_space<vmem>>, vector<1x256xf32>
      %cst_78 = arith.constant dense<0.000000e+00> : vector<16xf32>
      %160 = vector.multi_reduction <add>, %157, %cst_78 [1] : vector<16x256xf32> to vector<16xf32>
      %161 = vector.shape_cast %160 : vector<16xf32> to vector<16x1xf32>
      %cst_79 = arith.constant 2.560000e+02 : f32
      %162 = vector.broadcast %cst_79 : f32 to vector<16x1xf32>
      %163 = arith.divf %161, %162 : vector<16x1xf32>
      %164 = vector.broadcast %163 : vector<16x1xf32> to vector<16x256xf32>
      %165 = arith.subf %157, %164 : vector<16x256xf32>
      %166 = arith.mulf %165, %165 : vector<16x256xf32>
      %cst_80 = arith.constant dense<0.000000e+00> : vector<16xf32>
      %167 = vector.multi_reduction <add>, %166, %cst_80 [1] : vector<16x256xf32> to vector<16xf32>
      %168 = vector.shape_cast %167 : vector<16xf32> to vector<16x1xf32>
      %cst_81 = arith.constant 2.560000e+02 : f32
      %169 = vector.broadcast %cst_81 : f32 to vector<16x1xf32>
      %170 = arith.divf %168, %169 : vector<16x1xf32>
      %171 = vector.broadcast %163 : vector<16x1xf32> to vector<16x256xf32>
      %172 = arith.subf %157, %171 : vector<16x256xf32>
      %cst_82 = arith.constant 9.99999974E-6 : f32
      %173 = vector.broadcast %cst_82 : f32 to vector<16x1xf32>
      %174 = arith.addf %170, %173 : vector<16x1xf32>
      %175 = math.rsqrt %174 : vector<16x1xf32>
      %176 = vector.broadcast %175 : vector<16x1xf32> to vector<16x256xf32>
      %177 = arith.mulf %172, %176 : vector<16x256xf32>
      %178 = vector.broadcast %158 : vector<1x256xf32> to vector<16x256xf32>
      %179 = arith.mulf %177, %178 : vector<16x256xf32>
      %180 = vector.broadcast %159 : vector<1x256xf32> to vector<16x256xf32>
      %181 = arith.addf %179, %180 : vector<16x256xf32>
      %c0_83 = arith.constant 0 : index
      %c0_84 = arith.constant 0 : index
      %182 = vector.load %arg19[%c0_83, %c0_84] : memref<16x256xf32, #tpu.memory_space<vmem>>, vector<16x256xf32>
      tpu.vector_store %arg19[%c0_83, %c0_84], %181 {strides = array<i32>} : memref<16x256xf32, #tpu.memory_space<vmem>>, vector<16x256xf32>,
      %c0_85 = arith.constant 0 : index
      %c0_86 = arith.constant 0 : index
      %183 = vector.load %arg2[%c0_85, %c0_86] : memref<16x1xi32, #tpu.memory_space<vmem>>, vector<16x1xi32>
      %c0_87 = arith.constant 0 : index
      %c0_88 = arith.constant 0 : index
      %184 = vector.load %arg3[%c0_87, %c0_88] : memref<1x16xi32, #tpu.memory_space<vmem>>, vector<1x16xi32>
      %185 = vector.broadcast %183 : vector<16x1xi32> to vector<16x16xi32>
      %186 = vector.broadcast %184 : vector<1x16xi32> to vector<16x16xi32>
      %187 = arith.cmpi eq, %185, %186 : vector<16x16xi32>
      %cst_89 = arith.constant 0.000000e+00 : f32
      %cst_90 = arith.constant -1.000000e+30 : f32
      %188 = vector.broadcast %cst_89 : f32 to vector<16x16xf32>
      %189 = vector.broadcast %cst_90 : f32 to vector<16x16xf32>
      %190 = arith.select %187, %188, %189 : vector<16x16xi1>, vector<16x16xf32>
      %c0_91 = arith.constant 0 : index
      %c0_92 = arith.constant 0 : index
      %191 = vector.load %arg20[%c0_91, %c0_92] : memref<16x16xf32, #tpu.memory_space<vmem>>, vector<16x16xf32>
      tpu.vector_store %arg20[%c0_91, %c0_92], %190 {strides = array<i32>} : memref<16x16xf32, #tpu.memory_space<vmem>>, vector<16x16xf32>,
    } else {
    }
    %c0 = arith.constant 0 : index
    %c0_1 = arith.constant 0 : index
    %3 = vector.load %arg19[%c0, %c0_1] : memref<16x256xf32, #tpu.memory_space<vmem>>, vector<16x256xf32>
    %4 = arith.truncf %3 : vector<16x256xf32> to vector<16x256xbf16>
    %c0_2 = arith.constant 0 : index
    %c0_3 = arith.constant 0 : index
    %c0_4 = arith.constant 0 : index
    %5 = vector.load %arg6[%c0_2, %c0_3, %c0_4] : memref<1x256x768xbf16, #tpu.memory_space<vmem>>, vector<1x256x768xbf16>
    %6 = vector.shape_cast %5 : vector<1x256x768xbf16> to vector<256x768xbf16>
    %cst = arith.constant dense<0.000000e+00> : vector<16x768xf32>
    %7 = tpu.matmul %4, %6, %cst {dimension_numbers = #tpu.dot_dimension_numbers<[1], [0], [0], [1], [0, 0, 1, 1], [], []>} : vector<16x256xbf16>, vector<256x768xbf16>, vector<16x768xf32> -> vector<16x768xf32>
    %c0_5 = arith.constant 0 : index
    %c0_6 = arith.constant 0 : index
    %c0_7 = arith.constant 0 : index
    %8 = vector.load %arg7[%c0_5, %c0_6, %c0_7] : memref<1x1x768xf32, #tpu.memory_space<vmem>>, vector<1x1x768xf32>
    %9 = vector.shape_cast %8 : vector<1x1x768xf32> to vector<1x768xf32>
    %10 = vector.broadcast %9 : vector<1x768xf32> to vector<16x768xf32>
    %11 = arith.addf %7, %10 : vector<16x768xf32>
    %12 = vector.extract_strided_slice %11 {offsets = [0, 0], sizes = [16, 256], strides = [1, 1]} : vector<16x768xf32> to vector<16x256xf32>
    %13 = vector.extract_strided_slice %11 {offsets = [0, 256], sizes = [16, 256], strides = [1, 1]} : vector<16x768xf32> to vector<16x256xf32>
    %14 = vector.extract_strided_slice %11 {offsets = [0, 512], sizes = [16, 256], strides = [1, 1]} : vector<16x768xf32> to vector<16x256xf32>
    %15 = vector.extract_strided_slice %12 {offsets = [0, 0], sizes = [16, 128], strides = [1, 1]} : vector<16x256xf32> to vector<16x128xf32>
    %16 = arith.truncf %15 : vector<16x128xf32> to vector<16x128xbf16>
    %17 = vector.extract_strided_slice %13 {offsets = [0, 0], sizes = [16, 128], strides = [1, 1]} : vector<16x256xf32> to vector<16x128xf32>
    %18 = arith.truncf %17 : vector<16x128xf32> to vector<16x128xbf16>
    %19 = vector.extract_strided_slice %14 {offsets = [0, 0], sizes = [16, 128], strides = [1, 1]} : vector<16x256xf32> to vector<16x128xf32>
    %20 = arith.truncf %19 : vector<16x128xf32> to vector<16x128xbf16>
    %cst_8 = arith.constant dense<0.000000e+00> : vector<16x16xf32>
    %21 = tpu.matmul %16, %18, %cst_8 {dimension_numbers = #tpu.dot_dimension_numbers<[1], [1], [0], [0], [0, 0, 1, 0], [], []>} : vector<16x128xbf16>, vector<16x128xbf16>, vector<16x16xf32> -> vector<16x16xf32>
    %cst_9 = arith.constant 0.0883883461 : f32
    %22 = vector.broadcast %cst_9 : f32 to vector<16x16xf32>
    %23 = arith.mulf %21, %22 : vector<16x16xf32>
    %c0_10 = arith.constant 0 : index
    %c0_11 = arith.constant 0 : index
    %24 = vector.load %arg20[%c0_10, %c0_11] : memref<16x16xf32, #tpu.memory_space<vmem>>, vector<16x16xf32>
    %25 = arith.addf %23, %24 : vector<16x16xf32>
    %cst_12 = arith.constant dense<0xFF800000> : vector<16xf32>
    %26 = vector.multi_reduction <maximumf>, %25, %cst_12 [1] : vector<16x16xf32> to vector<16xf32>
    %27 = vector.shape_cast %26 : vector<16xf32> to vector<16x1xf32>
    %28 = vector.broadcast %27 : vector<16x1xf32> to vector<16x16xf32>
    %29 = arith.subf %25, %28 : vector<16x16xf32>
    %30 = math.exp %29 : vector<16x16xf32>
    %cst_13 = arith.constant dense<0.000000e+00> : vector<16xf32>
    %31 = vector.multi_reduction <add>, %30, %cst_13 [1] : vector<16x16xf32> to vector<16xf32>
    %32 = vector.shape_cast %31 : vector<16xf32> to vector<16x1xf32>
    %33 = tpu.reciprocal %32 {approx = true} : vector<16x1xf32> -> vector<16x1xf32>
    %34 = vector.broadcast %33 : vector<16x1xf32> to vector<16x16xf32>
    %35 = arith.mulf %30, %34 : vector<16x16xf32>
    %36 = arith.truncf %35 : vector<16x16xf32> to vector<16x16xbf16>
    %cst_14 = arith.constant dense<0.000000e+00> : vector<16x128xf32>
    %37 = tpu.matmul %36, %20, %cst_14 {dimension_numbers = #tpu.dot_dimension_numbers<[1], [0], [0], [1], [0, 0, 1, 1], [], []>} : vector<16x16xbf16>, vector<16x128xbf16>, vector<16x128xf32> -> vector<16x128xf32>
    %38 = vector.extract_strided_slice %12 {offsets = [0, 128], sizes = [16, 128], strides = [1, 1]} : vector<16x256xf32> to vector<16x128xf32>
    %39 = arith.truncf %38 : vector<16x128xf32> to vector<16x128xbf16>
    %40 = vector.extract_strided_slice %13 {offsets = [0, 128], sizes = [16, 128], strides = [1, 1]} : vector<16x256xf32> to vector<16x128xf32>
    %41 = arith.truncf %40 : vector<16x128xf32> to vector<16x128xbf16>
    %42 = vector.extract_strided_slice %14 {offsets = [0, 128], sizes = [16, 128], strides = [1, 1]} : vector<16x256xf32> to vector<16x128xf32>
    %43 = arith.truncf %42 : vector<16x128xf32> to vector<16x128xbf16>
    %cst_15 = arith.constant dense<0.000000e+00> : vector<16x16xf32>
    %44 = tpu.matmul %39, %41, %cst_15 {dimension_numbers = #tpu.dot_dimension_numbers<[1], [1], [0], [0], [0, 0, 1, 0], [], []>} : vector<16x128xbf16>, vector<16x128xbf16>, vector<16x16xf32> -> vector<16x16xf32>
    %cst_16 = arith.constant 0.0883883461 : f32
    %45 = vector.broadcast %cst_16 : f32 to vector<16x16xf32>
    %46 = arith.mulf %44, %45 : vector<16x16xf32>
    %c0_17 = arith.constant 0 : index
    %c0_18 = arith.constant 0 : index
    %47 = vector.load %arg20[%c0_17, %c0_18] : memref<16x16xf32, #tpu.memory_space<vmem>>, vector<16x16xf32>
    %48 = arith.addf %46, %47 : vector<16x16xf32>
    %cst_19 = arith.constant dense<0xFF800000> : vector<16xf32>
    %49 = vector.multi_reduction <maximumf>, %48, %cst_19 [1] : vector<16x16xf32> to vector<16xf32>
    %50 = vector.shape_cast %49 : vector<16xf32> to vector<16x1xf32>
    %51 = vector.broadcast %50 : vector<16x1xf32> to vector<16x16xf32>
    %52 = arith.subf %48, %51 : vector<16x16xf32>
    %53 = math.exp %52 : vector<16x16xf32>
    %cst_20 = arith.constant dense<0.000000e+00> : vector<16xf32>
    %54 = vector.multi_reduction <add>, %53, %cst_20 [1] : vector<16x16xf32> to vector<16xf32>
    %55 = vector.shape_cast %54 : vector<16xf32> to vector<16x1xf32>
    %56 = tpu.reciprocal %55 {approx = true} : vector<16x1xf32> -> vector<16x1xf32>
    %57 = vector.broadcast %56 : vector<16x1xf32> to vector<16x16xf32>
    %58 = arith.mulf %53, %57 : vector<16x16xf32>
    %59 = arith.truncf %58 : vector<16x16xf32> to vector<16x16xbf16>
    %cst_21 = arith.constant dense<0.000000e+00> : vector<16x128xf32>
    %60 = tpu.matmul %59, %43, %cst_21 {dimension_numbers = #tpu.dot_dimension_numbers<[1], [0], [0], [1], [0, 0, 1, 1], [], []>} : vector<16x16xbf16>, vector<16x128xbf16>, vector<16x128xf32> -> vector<16x128xf32>
    %61 = tpu.concatenate %37, %60 in 1 : vector<16x128xf32>, vector<16x128xf32> -> vector<16x256xf32>
    %62 = arith.truncf %61 : vector<16x256xf32> to vector<16x256xbf16>
    %c0_22 = arith.constant 0 : index
    %c0_23 = arith.constant 0 : index
    %c0_24 = arith.constant 0 : index
    %63 = vector.load %arg8[%c0_22, %c0_23, %c0_24] : memref<1x256x256xbf16, #tpu.memory_space<vmem>>, vector<1x256x256xbf16>
    %64 = vector.shape_cast %63 : vector<1x256x256xbf16> to vector<256x256xbf16>
    %cst_25 = arith.constant dense<0.000000e+00> : vector<16x256xf32>
    %65 = tpu.matmul %62, %64, %cst_25 {dimension_numbers = #tpu.dot_dimension_numbers<[1], [0], [0], [1], [0, 0, 1, 1], [], []>} : vector<16x256xbf16>, vector<256x256xbf16>, vector<16x256xf32> -> vector<16x256xf32>
    %c0_26 = arith.constant 0 : index
    %c0_27 = arith.constant 0 : index
    %c0_28 = arith.constant 0 : index
    %66 = vector.load %arg9[%c0_26, %c0_27, %c0_28] : memref<1x1x256xf32, #tpu.memory_space<vmem>>, vector<1x1x256xf32>
    %67 = vector.shape_cast %66 : vector<1x1x256xf32> to vector<1x256xf32>
    %68 = vector.broadcast %67 : vector<1x256xf32> to vector<16x256xf32>
    %69 = arith.addf %65, %68 : vector<16x256xf32>
    %70 = arith.addf %69, %3 : vector<16x256xf32>
    %c0_29 = arith.constant 0 : index
    %c0_30 = arith.constant 0 : index
    %c0_31 = arith.constant 0 : index
    %71 = vector.load %arg10[%c0_29, %c0_30, %c0_31] : memref<1x1x256xf32, #tpu.memory_space<vmem>>, vector<1x1x256xf32>
    %72 = vector.shape_cast %71 : vector<1x1x256xf32> to vector<1x256xf32>
    %c0_32 = arith.constant 0 : index
    %c0_33 = arith.constant 0 : index
    %c0_34 = arith.constant 0 : index
    %73 = vector.load %arg11[%c0_32, %c0_33, %c0_34] : memref<1x1x256xf32, #tpu.memory_space<vmem>>, vector<1x1x256xf32>
    %74 = vector.shape_cast %73 : vector<1x1x256xf32> to vector<1x256xf32>
    %cst_35 = arith.constant dense<0.000000e+00> : vector<16xf32>
    %75 = vector.multi_reduction <add>, %70, %cst_35 [1] : vector<16x256xf32> to vector<16xf32>
    %76 = vector.shape_cast %75 : vector<16xf32> to vector<16x1xf32>
    %cst_36 = arith.constant 2.560000e+02 : f32
    %77 = vector.broadcast %cst_36 : f32 to vector<16x1xf32>
    %78 = arith.divf %76, %77 : vector<16x1xf32>
    %79 = vector.broadcast %78 : vector<16x1xf32> to vector<16x256xf32>
    %80 = arith.subf %70, %79 : vector<16x256xf32>
    %81 = arith.mulf %80, %80 : vector<16x256xf32>
    %cst_37 = arith.constant dense<0.000000e+00> : vector<16xf32>
    %82 = vector.multi_reduction <add>, %81, %cst_37 [1] : vector<16x256xf32> to vector<16xf32>
    %83 = vector.shape_cast %82 : vector<16xf32> to vector<16x1xf32>
    %cst_38 = arith.constant 2.560000e+02 : f32
    %84 = vector.broadcast %cst_38 : f32 to vector<16x1xf32>
    %85 = arith.divf %83, %84 : vector<16x1xf32>
    %86 = vector.broadcast %78 : vector<16x1xf32> to vector<16x256xf32>
    %87 = arith.subf %70, %86 : vector<16x256xf32>
    %cst_39 = arith.constant 9.99999974E-6 : f32
    %88 = vector.broadcast %cst_39 : f32 to vector<16x1xf32>
    %89 = arith.addf %85, %88 : vector<16x1xf32>
    %90 = math.rsqrt %89 : vector<16x1xf32>
    %91 = vector.broadcast %90 : vector<16x1xf32> to vector<16x256xf32>
    %92 = arith.mulf %87, %91 : vector<16x256xf32>
    %93 = vector.broadcast %72 : vector<1x256xf32> to vector<16x256xf32>
    %94 = arith.mulf %92, %93 : vector<16x256xf32>
    %95 = vector.broadcast %74 : vector<1x256xf32> to vector<16x256xf32>
    %96 = arith.addf %94, %95 : vector<16x256xf32>
    %97 = arith.truncf %96 : vector<16x256xf32> to vector<16x256xbf16>
    %c0_40 = arith.constant 0 : index
    %c0_41 = arith.constant 0 : index
    %c0_42 = arith.constant 0 : index
    %98 = vector.load %arg12[%c0_40, %c0_41, %c0_42] : memref<1x256x512xbf16, #tpu.memory_space<vmem>>, vector<1x256x512xbf16>
    %99 = vector.shape_cast %98 : vector<1x256x512xbf16> to vector<256x512xbf16>
    %cst_43 = arith.constant dense<0.000000e+00> : vector<16x512xf32>
    %100 = tpu.matmul %97, %99, %cst_43 {dimension_numbers = #tpu.dot_dimension_numbers<[1], [0], [0], [1], [0, 0, 1, 1], [], []>} : vector<16x256xbf16>, vector<256x512xbf16>, vector<16x512xf32> -> vector<16x512xf32>
    %c0_44 = arith.constant 0 : index
    %c0_45 = arith.constant 0 : index
    %c0_46 = arith.constant 0 : index
    %101 = vector.load %arg13[%c0_44, %c0_45, %c0_46] : memref<1x1x512xf32, #tpu.memory_space<vmem>>, vector<1x1x512xf32>
    %102 = vector.shape_cast %101 : vector<1x1x512xf32> to vector<1x512xf32>
    %103 = vector.broadcast %102 : vector<1x512xf32> to vector<16x512xf32>
    %104 = arith.addf %100, %103 : vector<16x512xf32>
    %105 = arith.mulf %104, %104 : vector<16x512xf32>
    %106 = arith.mulf %104, %105 : vector<16x512xf32>
    %cst_47 = arith.constant 4.471500e-02 : f32
    %107 = vector.broadcast %cst_47 : f32 to vector<16x512xf32>
    %108 = arith.mulf %107, %106 : vector<16x512xf32>
    %109 = arith.addf %104, %108 : vector<16x512xf32>
    %cst_48 = arith.constant 0.797884583 : f32
    %110 = vector.broadcast %cst_48 : f32 to vector<16x512xf32>
    %111 = arith.mulf %110, %109 : vector<16x512xf32>
    %112 = math.tanh %111 : vector<16x512xf32>
    %cst_49 = arith.constant 1.000000e+00 : f32
    %113 = vector.broadcast %cst_49 : f32 to vector<16x512xf32>
    %114 = arith.addf %113, %112 : vector<16x512xf32>
    %cst_50 = arith.constant 5.000000e-01 : f32
    %115 = vector.broadcast %cst_50 : f32 to vector<16x512xf32>
    %116 = arith.mulf %115, %114 : vector<16x512xf32>
    %117 = arith.mulf %104, %116 : vector<16x512xf32>
    %118 = arith.truncf %117 : vector<16x512xf32> to vector<16x512xbf16>
    %c0_51 = arith.constant 0 : index
    %c0_52 = arith.constant 0 : index
    %c0_53 = arith.constant 0 : index
    %119 = vector.load %arg14[%c0_51, %c0_52, %c0_53] : memref<1x512x256xbf16, #tpu.memory_space<vmem>>, vector<1x512x256xbf16>
    %120 = vector.shape_cast %119 : vector<1x512x256xbf16> to vector<512x256xbf16>
    %cst_54 = arith.constant dense<0.000000e+00> : vector<16x256xf32>
    %121 = tpu.matmul %118, %120, %cst_54 {dimension_numbers = #tpu.dot_dimension_numbers<[1], [0], [0], [1], [0, 0, 1, 1], [], []>} : vector<16x512xbf16>, vector<512x256xbf16>, vector<16x256xf32> -> vector<16x256xf32>
    %c0_55 = arith.constant 0 : index
    %c0_56 = arith.constant 0 : index
    %c0_57 = arith.constant 0 : index
    %122 = vector.load %arg15[%c0_55, %c0_56, %c0_57] : memref<1x1x256xf32, #tpu.memory_space<vmem>>, vector<1x1x256xf32>
    %123 = vector.shape_cast %122 : vector<1x1x256xf32> to vector<1x256xf32>
    %124 = vector.broadcast %123 : vector<1x256xf32> to vector<16x256xf32>
    %125 = arith.addf %121, %124 : vector<16x256xf32>
    %126 = arith.addf %125, %96 : vector<16x256xf32>
    %c0_58 = arith.constant 0 : index
    %c0_59 = arith.constant 0 : index
    %c0_60 = arith.constant 0 : index
    %127 = vector.load %arg16[%c0_58, %c0_59, %c0_60] : memref<1x1x256xf32, #tpu.memory_space<vmem>>, vector<1x1x256xf32>
    %128 = vector.shape_cast %127 : vector<1x1x256xf32> to vector<1x256xf32>
    %c0_61 = arith.constant 0 : index
    %c0_62 = arith.constant 0 : index
    %c0_63 = arith.constant 0 : index
    %129 = vector.load %arg17[%c0_61, %c0_62, %c0_63] : memref<1x1x256xf32, #tpu.memory_space<vmem>>, vector<1x1x256xf32>
    %130 = vector.shape_cast %129 : vector<1x1x256xf32> to vector<1x256xf32>
    %cst_64 = arith.constant dense<0.000000e+00> : vector<16xf32>
    %131 = vector.multi_reduction <add>, %126, %cst_64 [1] : vector<16x256xf32> to vector<16xf32>
    %132 = vector.shape_cast %131 : vector<16xf32> to vector<16x1xf32>
    %cst_65 = arith.constant 2.560000e+02 : f32
    %133 = vector.broadcast %cst_65 : f32 to vector<16x1xf32>
    %134 = arith.divf %132, %133 : vector<16x1xf32>
    %135 = vector.broadcast %134 : vector<16x1xf32> to vector<16x256xf32>
    %136 = arith.subf %126, %135 : vector<16x256xf32>
    %137 = arith.mulf %136, %136 : vector<16x256xf32>
    %cst_66 = arith.constant dense<0.000000e+00> : vector<16xf32>
    %138 = vector.multi_reduction <add>, %137, %cst_66 [1] : vector<16x256xf32> to vector<16xf32>
    %139 = vector.shape_cast %138 : vector<16xf32> to vector<16x1xf32>
    %cst_67 = arith.constant 2.560000e+02 : f32
    %140 = vector.broadcast %cst_67 : f32 to vector<16x1xf32>
    %141 = arith.divf %139, %140 : vector<16x1xf32>
    %142 = vector.broadcast %134 : vector<16x1xf32> to vector<16x256xf32>
    %143 = arith.subf %126, %142 : vector<16x256xf32>
    %cst_68 = arith.constant 9.99999974E-6 : f32
    %144 = vector.broadcast %cst_68 : f32 to vector<16x1xf32>
    %145 = arith.addf %141, %144 : vector<16x1xf32>
    %146 = math.rsqrt %145 : vector<16x1xf32>
    %147 = vector.broadcast %146 : vector<16x1xf32> to vector<16x256xf32>
    %148 = arith.mulf %143, %147 : vector<16x256xf32>
    %149 = vector.broadcast %128 : vector<1x256xf32> to vector<16x256xf32>
    %150 = arith.mulf %148, %149 : vector<16x256xf32>
    %151 = vector.broadcast %130 : vector<1x256xf32> to vector<16x256xf32>
    %152 = arith.addf %150, %151 : vector<16x256xf32>
    %c0_69 = arith.constant 0 : index
    %c0_70 = arith.constant 0 : index
    %153 = vector.load %arg19[%c0_69, %c0_70] : memref<16x256xf32, #tpu.memory_space<vmem>>, vector<16x256xf32>
    tpu.vector_store %arg19[%c0_69, %c0_70], %152 {strides = array<i32>} : memref<16x256xf32, #tpu.memory_space<vmem>>, vector<16x256xf32>,
    %c1_i32 = arith.constant 1 : i32
    %154 = arith.cmpi eq, %arg0, %c1_i32 : i32
    %155 = arith.extui %154 : i1 to i32
    %c0_i32_71 = arith.constant 0 : i32
    %156 = arith.cmpi ne, %155, %c0_i32_71 : i32
    scf.if %156 {
      %157 = arith.truncf %152 : vector<16x256xf32> to vector<16x256xbf16>
      %c0_72 = arith.constant 0 : index
      %c0_73 = arith.constant 0 : index
      %158 = vector.load %arg18[%c0_72, %c0_73] : memref<16x256xbf16, #tpu.memory_space<vmem>>, vector<16x256xbf16>
      tpu.vector_store %arg18[%c0_72, %c0_73], %157 {strides = array<i32>} : memref<16x256xbf16, #tpu.memory_space<vmem>>, vector<16x256xbf16>,
    } else {
    }
    return
  }
  func.func @transform_0(%arg0: i32) -> (i32, i32) {
    %c0_i32 = arith.constant 0 : i32
    %c0_i32_0 = arith.constant 0 : i32
    %c0_i32_1 = arith.constant 0 : i32
    return %c0_i32, %c0_i32_0 : i32, i32
  }
  func.func @transform_1(%arg0: i32) -> (i32, i32) {
    %c0_i32 = arith.constant 0 : i32
    %c0_i32_0 = arith.constant 0 : i32
    %c0_i32_1 = arith.constant 0 : i32
    return %c0_i32, %c0_i32_0 : i32, i32
  }
  func.func @transform_2(%arg0: i32) -> (i32, i32) {
    %c0_i32 = arith.constant 0 : i32
    %c0_i32_0 = arith.constant 0 : i32
    %c0_i32_1 = arith.constant 0 : i32
    return %c0_i32, %c0_i32_0 : i32, i32
  }
  func.func @transform_3(%arg0: i32) -> (i32, i32) {
    %c0_i32 = arith.constant 0 : i32
    %c0_i32_0 = arith.constant 0 : i32
    %c0_i32_1 = arith.constant 0 : i32
    return %c0_i32, %c0_i32_0 : i32, i32
  }
  func.func @transform_4(%arg0: i32) -> (i32, i32) {
    %c0_i32 = arith.constant 0 : i32
    %c0_i32_0 = arith.constant 0 : i32
    %c0_i32_1 = arith.constant 0 : i32
    return %c0_i32, %c0_i32_0 : i32, i32
  }
  func.func @transform_5(%arg0: i32) -> (i32, i32, i32) {
    %c0_i32 = arith.constant 0 : i32
    %c0_i32_0 = arith.constant 0 : i32
    %c0_i32_1 = arith.constant 0 : i32
    return %arg0, %c0_i32, %c0_i32_0 : i32, i32, i32
  }
  func.func @transform_6(%arg0: i32) -> (i32, i32, i32) {
    %c0_i32 = arith.constant 0 : i32
    %c0_i32_0 = arith.constant 0 : i32
    %c0_i32_1 = arith.constant 0 : i32
    return %arg0, %c0_i32, %c0_i32_0 : i32, i32, i32
  }
  func.func @transform_7(%arg0: i32) -> (i32, i32, i32) {
    %c0_i32 = arith.constant 0 : i32
    %c0_i32_0 = arith.constant 0 : i32
    %c0_i32_1 = arith.constant 0 : i32
    return %arg0, %c0_i32, %c0_i32_0 : i32, i32, i32
  }
  func.func @transform_8(%arg0: i32) -> (i32, i32, i32) {
    %c0_i32 = arith.constant 0 : i32
    %c0_i32_0 = arith.constant 0 : i32
    %c0_i32_1 = arith.constant 0 : i32
    return %arg0, %c0_i32, %c0_i32_0 : i32, i32, i32
  }
  func.func @transform_9(%arg0: i32) -> (i32, i32, i32) {
    %c0_i32 = arith.constant 0 : i32
    %c0_i32_0 = arith.constant 0 : i32
    %c0_i32_1 = arith.constant 0 : i32
    return %arg0, %c0_i32, %c0_i32_0 : i32, i32, i32
  }
  func.func @transform_10(%arg0: i32) -> (i32, i32, i32) {
    %c0_i32 = arith.constant 0 : i32
    %c0_i32_0 = arith.constant 0 : i32
    %c0_i32_1 = arith.constant 0 : i32
    return %arg0, %c0_i32, %c0_i32_0 : i32, i32, i32
  }
  func.func @transform_11(%arg0: i32) -> (i32, i32, i32) {
    %c0_i32 = arith.constant 0 : i32
    %c0_i32_0 = arith.constant 0 : i32
    %c0_i32_1 = arith.constant 0 : i32
    return %arg0, %c0_i32, %c0_i32_0 : i32, i32, i32
  }
  func.func @transform_12(%arg0: i32) -> (i32, i32, i32) {
    %c0_i32 = arith.constant 0 : i32
    %c0_i32_0 = arith.constant 0 : i32
    %c0_i32_1 = arith.constant 0 : i32
    return %arg0, %c0_i32, %c0_i32_0 : i32, i32, i32
  }
  func.func @transform_13(%arg0: i32) -> (i32, i32, i32) {
    %c0_i32 = arith.constant 0 : i32
    %c0_i32_0 = arith.constant 0 : i32
    %c0_i32_1 = arith.constant 0 : i32
    return %arg0, %c0_i32, %c0_i32_0 : i32, i32, i32
  }
  func.func @transform_14(%arg0: i32) -> (i32, i32, i32) {
    %c0_i32 = arith.constant 0 : i32
    %c0_i32_0 = arith.constant 0 : i32
    %c0_i32_1 = arith.constant 0 : i32
    return %arg0, %c0_i32, %c0_i32_0 : i32, i32, i32
  }
  func.func @transform_15(%arg0: i32) -> (i32, i32, i32) {
    %c0_i32 = arith.constant 0 : i32
    %c0_i32_0 = arith.constant 0 : i32
    %c0_i32_1 = arith.constant 0 : i32
    return %arg0, %c0_i32, %c0_i32_0 : i32, i32, i32
  }
  func.func @transform_16(%arg0: i32) -> (i32, i32, i32) {
    %c0_i32 = arith.constant 0 : i32
    %c0_i32_0 = arith.constant 0 : i32
    %c0_i32_1 = arith.constant 0 : i32
    return %arg0, %c0_i32, %c0_i32_0 : i32, i32, i32
  }
  func.func @transform_17(%arg0: i32) -> (i32, i32) {
    %c0_i32 = arith.constant 0 : i32
    %c0_i32_0 = arith.constant 0 : i32
    %c0_i32_1 = arith.constant 0 : i32
    return %c0_i32, %c0_i32_0 : i32, i32
  }
}

</mosaic_0001>

<bundles_post_ra>
// kernel: tpu_custom_call.1
= control target key start
LH: loop header
LB: loop body
LE: loop exit
PB: predicated region body
PF: predicated region fallthrough
CT: control target
= control target key end

     0   :  { %s5822_s0 = inlined_call_operand.hbm [shape: f32[16,256], index: 0, kind: input, shape index: {}]   ;;  %s5823_s1 = inlined_call_operand.vmem [shape: s32[16,1], index: 1, kind: input, shape index: {}]   ;;  %s5824_s2 = inlined_call_operand.hbm [shape: s32[1,16], index: 2, kind: input, shape index: {}]   ;;  %s5825_s3 = inlined_call_operand.hbm [shape: f32[1,256], index: 3, kind: input, shape index: {}]   ;;  %s5826_s4 = inlined_call_operand.hbm [shape: f32[1,256], index: 4, kind: input, shape index: {}]   ;;  %s5827_s5 = inlined_call_operand.hbm [shape: bf16[2,256,768], index: 5, kind: input, shape index: {}]   ;;  %s5828_s6 = inlined_call_operand.vmem [shape: f32[2,1,768], index: 6, kind: input, shape index: {}]   ;;  %s5829_s7 = inlined_call_operand.hbm [shape: bf16[2,256,256], index: 7, kind: input, shape index: {}]   ;;  %s5830_s8 = inlined_call_operand.vmem [shape: f32[2,1,256], index: 8, kind: input, shape index: {}]   ;;  %s5831_s9 = inlined_call_operand.vmem [shape: f32[2,1,256], index: 9, kind: input, shape index: {}]   ;;  %s5832_s10 = inlined_call_operand.vmem [shape: f32[2,1,256], index: 10, kind: input, shape index: {}]   ;;  %s5833_s11 = inlined_call_operand.hbm [shape: bf16[2,256,512], index: 11, kind: input, shape index: {}]   ;;  %s5834_s12 = inlined_call_operand.vmem [shape: f32[2,1,512], index: 12, kind: input, shape index: {}]   ;;  %s5835_s13 = inlined_call_operand.hbm [shape: bf16[2,512,256], index: 13, kind: input, shape index: {}]   ;;  %s5836_s14 = inlined_call_operand.vmem [shape: f32[2,1,256], index: 14, kind: input, shape index: {}]   ;;  %s5837_s15 = inlined_call_operand.vmem [shape: f32[2,1,256], index: 15, kind: input, shape index: {}]   ;;  %s5838_s16 = inlined_call_operand.vmem [shape: f32[2,1,256], index: 16, kind: input, shape index: {}]   ;;  %s5839_s17 = inlined_call_operand.hbm [shape: bf16[16,256], index: 17, kind: output, shape index: {}]  }
   0x1   :  { %5864 = sst [smem:[#allocation25_spill]] %s5822_s0 }
   0x2   :  { %5865 = sst [smem:[#allocation26_spill]] %s5823_s1 }
   0x3   :  { %5866 = sst [smem:[#allocation27_spill]] %s5824_s2 }
   0x4   :  { %5867 = sst [smem:[#allocation28_spill]] %s5825_s3 }
   0x5   :  { %5868 = sst [smem:[#allocation29_spill]] %s5826_s4 }
   0x6   :  { %5869 = sst [smem:[#allocation30_spill]] %s5827_s5 }
   0x7   :  { %5870 = sst [smem:[#allocation31_spill]] %s5828_s6 }
   0x8   :  { %5871 = sst [smem:[#allocation32_spill]] %s5829_s7 }
   0x9   :  { %5872 = sst [smem:[#allocation33_spill]] %s5830_s8 }
   0xa   :  { %5873 = sst [smem:[#allocation34_spill]] %s5831_s9 }
   0xb   :  { %5874 = sst [smem:[#allocation35_spill]] %s5832_s10 }
   0xc   :  { %5875 = sst [smem:[#allocation36_spill]] %s5834_s12 }
   0xd   :  { %5876 = sst [smem:[#allocation37_spill]] %s5836_s14 }
   0xe   :  { %5877 = sst [smem:[#allocation38_spill]] %s5837_s15 }
   0xf   :  { %5878 = sst [smem:[#allocation39_spill]] %s5838_s16 }
  0x10   :  { %5879 = sst [smem:[#allocation40_spill]] %s5839_s17 }
  0x11   :  { %22 = vsyncpa [#allocation5], 0 }
  0x12   :  { %23 = vsyncpa [#allocation8], 0 }
  0x13   :  { %24 = vsyncpa [#allocation11], 0 }
  0x14   :  { %25 = vsyncpa [#allocation6], 0  ;;  %s4956_s24 = smov 0   ;;  %s4958_s25 = smov 0  }
  0x15   :  { %s4960_s26 = smov 0   ;;  %s4962_s27 = smov 0  }
  0x16 LB: > { %5880 = sst [smem:[#allocation22_spill]] %s4839_s26  ;;  %s4975_s28 = sadd.s32 4294967295, %s4843_s27   ;;  %s4843_s27 = sphi %s4962_s27, %s5936_s27   ;;  %s4839_s26 = sphi %s4960_s26, %s5938_s26   ;;  %s4835_s25 = sphi %s4958_s25, %s5940_s25   ;;  %s4831_s24 = sphi %s4956_s24, %s5939_s24  }
  0x17   : > { %p156_p0 = scmp.ne.s32.totalorder %s4835_s25, %s4831_s24  ;;  %p5843_p1 = scmp.eq.s32.totalorder %s4975_s28, 0 }
  0x18   : > { %p3640_p2 = scmp.ge.s32.totalorder %s4843_s27, 1  ;;  %p474_p3 = scmp.lt.s32.totalorder %s4843_s27, 3 }
  0x19   : > { %p4984_p5 = por %p5843_p1, %p156_p0  ;;  %s4845_s30 = smov [#allocation4]  }
  0x1a   : > { %p4988_p6 = pnand %p3640_p2, %p474_p3  ;;  %s486_s18 = sshll.u32 %s4845_s30, 4  ;;  %s487_s18 = int_to_ptr.vmem [resolvable:$true] %s486_s18 }
  0x1b   : > { %s5881_s29 = scalar_select %p4984_p5, 1, 0 }
  0x1c   : > { %s5882_s0 = scalar_select %p4988_p6, 1, 0 }
  0x1d   : > { %p4015_p7 = pneg %p4988_p6  ;;  %s5001_s1 = sadd.s32 1, %s4843_s27  }
  0x1e   : > { %5884 = sst [smem:[#allocation23_spill]] %s5001_s1  ;;  %s143_s20 = sadd.s32 1, %s4839_s26 }
  0x1f   : > { %p4996_p8 = pnand %p4015_p7, %p5843_p1  ;;  %s140_s21 = ssub.s32 %s4843_s27, %s5001_s1 }
  0x20   : > { %s5885_s24 = sld [smem:[#allocation25_spill]] }
  0x21   : > { %s5883_s19 = scalar_select %p4996_p8, 1, 0 }
  0x22   : > { %p5014_p10 = pneg %p4996_p8 }
  0x24   : > { %s5887_s12 = scalar_select %p5014_p10, 1, 0 }
  0x26   : > { %s5886_s17 = smov %s5885_s24  ;;  %s4535_s16 = scalar_lea.hbm %s5885_s24, 512 }
  0x27   : > { %p4536_p9 = scmp.ne.s32.totalorder %s5886_s17, %s4535_s16  ;;  %p4542_p13 = scmp.lt.u32.totalorder %s4535_s16, %s5886_s17 }
  0x29   : > { %p4538_p11 = pnand %p5014_p10, %p4536_p9 }
  0x2b   : > { %p4539_p12 = pneg %p4538_p11 }
  0x2d   : > { %p4544_p0 = pnand %p4542_p13, %p4539_p12 }
  0x2f   : > { %4547 = shalt.err (!%p4544_p0)
}
  0x30   : > { %s4548_s22 = scalar_lea.vmem %s487_s18, 512  ;;  %p4556_p4 = scmp.lt.s32.totalorder %s487_s18, %s487_s18 }
  0x31   : > { %p4549_p2 = scmp.ne.s32.totalorder %s487_s18, %s4548_s22  ;;  %p4557_p1 = scmp.lt.s32.totalorder %s4548_s22, %s4548_s22 }
  0x33   : > { %p4551_p3 = pnand %p4549_p2, %p5014_p10  ;;  %p4558_p5 = por %p4557_p1, %p4556_p4 }
  0x35   : > { %p4552_p7 = pneg %p4551_p3 }
  0x37   : > { %p4559_p6 = pnand %p4558_p5, %p4552_p7 }
  0x39   : > { %4562 = shalt.err (!%p4559_p6)
}
  0x3a   : > { %s5848_s15 = smov 256   ;;  %s5849_s10 = smov 16  }
  0x3b   : > { %4018 = dma.hbm_to_vmem [thread:$0]  (!%p4996_p8), %s5886_s17, 512, %s487_s18, [#allocation5], %s5848_s15, %s5848_s15, %s5849_s10  }
  0x3c   : > { %p141_p1 = scmp.eq.s32.totalorder %s140_s21, 0  ;;  %p150_p4 = scmp.ne.s32.totalorder %s4839_s26, %s4835_s25 }
  0x3d   : > { %p151_p5 = scmp.eq.s32.totalorder %s4843_s27, 0  ;;  %p4045_p6 = scmp.lt.s32.totalorder %s4843_s27, 2 }
  0x3e   : > { %s5038_s23 = scalar_select %p141_p1, %s4839_s26, %s143_s20  }
  0x3f   : > { %p152_p9 = por %p151_p5, %p150_p4  ;;  %s536_s24 = sand.u32 1, %s4843_s27  }
  0x40   : > { %5888 = sst [smem:[#allocation24_spill]] %s5038_s23  ;;  %s5042_s30 = sand.u32 1, %s4839_s26  }
  0x41   : > { %s3983_s22 = smul.u32 768, %s5042_s30  ;;  %p5045_p11 = pnand %p4045_p6, %p152_p9 }
  0x42   : > { %s3984_s6 = smul.u32 12288, %s4843_s27  ;;  %s5890_s5 = sld [smem:[#allocation30_spill]] }
  0x43   : > { %s5889_s1 = scalar_select %p5045_p11, 1, 0 }
  0x44   : > { %s540_s20 = scalar_lea.vmem [#allocation12], %s3983_s22  ;;  %s5057_s15 = scalar_lea.sflag [#allocation5], %s536_s24 }
  0x45   : > { %s547_s16 = sshll.u32 %s540_s20, 4  ;;  %p5063_p13 = pneg %p5045_p11  ;;  %s5055_s16 = int_to_ptr.vmem [resolvable:$true] %s547_s16 }
  0x47   : > { %s5891_s17 = scalar_select %p5063_p13, 1, 0 }
  0x48   : > { %s5053_s21 = scalar_lea.hbm %s5890_s5, %s3984_s6  ;;  %s4568_s22 = scalar_lea.hbm %s5890_s5, 24576 }
  0x49   : > { %s4563_s10 = scalar_lea.hbm %s5053_s21, 12288  ;;  %p4569_p3 = scmp.lt.u32.totalorder %s5053_s21, %s5890_s5 }
  0x4a   : > { %p4564_p12 = scmp.ne.s32.totalorder %s5053_s21, %s4563_s10  ;;  %p4570_p7 = scmp.lt.u32.totalorder %s4568_s22, %s4563_s10 }
  0x4b   : > { %p4572_p4 = scmp.lt.u32.totalorder %s4563_s10, %s5053_s21 }
  0x4c   : > { %p4566_p0 = pnand %p5063_p13, %p4564_p12  ;;  %p4571_p1 = por %p4570_p7, %p4569_p3 }
  0x4e   : > { %p4567_p2 = pneg %p4566_p0  ;;  %p4573_p5 = por %p4572_p4, %p4571_p1 }
  0x50   : > { %p4574_p6 = pnand %p4573_p5, %p4567_p2 }
  0x52   : > { %4577 = shalt.err (!%p4574_p6)
}
  0x53   : > { %s4578_s24 = scalar_lea.vmem %s5055_s16, 12288  ;;  %s4848_s6 = smov [#allocation12]  }
  0x54   : > { %p4579_p9 = scmp.ne.s32.totalorder %s5055_s16, %s4578_s24  ;;  %s4583_s14 = sshll.u32 %s4848_s6, 4  ;;  %s4584_s14 = int_to_ptr.vmem [resolvable:$false] %s4583_s14 }
  0x55   : > { %s4585_s18 = scalar_lea.vmem %s4584_s14, 24576  ;;  %p4586_p8 = scmp.lt.s32.totalorder %s5055_s16, %s4584_s14 }
  0x56   : > { %p4581_p12 = pnand %p4579_p9, %p5063_p13  ;;  %p4587_p10 = scmp.lt.s32.totalorder %s4585_s18, %s4578_s24 }
  0x58   : > { %p4582_p0 = pneg %p4581_p12  ;;  %p4588_p3 = por %p4587_p10, %p4586_p8 }
  0x5a   : > { %p4589_p7 = pnand %p4588_p3, %p4582_p0 }
  0x5c   : > { %4592 = shalt.err (!%p4589_p7)
}
  0x5d   : > { %s4849_s10 = smov 384   ;;  %s4850_s22 = smov 24  }
  0x5e   : > { %4031 = dma.hbm_to_vmem [thread:$0]  (!%p5045_p11), %s5053_s21, 12288, %s5055_s16, %s5057_s15, %s4849_s10, %s4849_s10, %s4850_s22  }
  0x5f   : > { %s3647_s20 = sshll.u32 %s5042_s30, 8  ;;  %s3938_s6 = sshll.u32 %s4843_s27, 12 }
  0x60   : > { %s5892_s7 = sld [smem:[#allocation32_spill]]  ;;  %s568_s14 = scalar_lea.vmem [#allocation13], %s3647_s20 }
  0x61   : > { %s575_s18 = sshll.u32 %s568_s14, 4  ;;  %s5094_s18 = int_to_ptr.vmem [resolvable:$true] %s575_s18 }
  0x66   : > { %s5092_s24 = scalar_lea.hbm %s5892_s7, %s3938_s6  ;;  %s4598_s10 = scalar_lea.hbm %s5892_s7, 8192 }
  0x67   : > { %s4593_s26 = scalar_lea.hbm %s5092_s24, 4096  ;;  %p4599_p1 = scmp.lt.u32.totalorder %s5092_s24, %s5892_s7 }
  0x68   : > { %p4594_p8 = scmp.ne.s32.totalorder %s5092_s24, %s4593_s26  ;;  %p4600_p4 = scmp.lt.u32.totalorder %s4598_s10, %s4593_s26 }
  0x69   : > { %p4602_p6 = scmp.lt.u32.totalorder %s4593_s26, %s5092_s24 }
  0x6a   : > { %p4596_p10 = pnand %p4594_p8, %p5063_p13  ;;  %p4601_p5 = por %p4600_p4, %p4599_p1 }
  0x6c   : > { %p4597_p2 = pneg %p4596_p10  ;;  %p4603_p9 = por %p4602_p6, %p4601_p5 }
  0x6e   : > { %p4604_p12 = pnand %p4603_p9, %p4597_p2 }
  0x70   : > { %4607 = shalt.err (!%p4604_p12)
}
  0x71   : > { %s4608_s22 = scalar_lea.vmem %s5094_s18, 4096  ;;  %s4851_s20 = smov [#allocation13]  }
  0x72   : > { %p4609_p0 = scmp.ne.s32.totalorder %s5094_s18, %s4608_s22  ;;  %s4613_s6 = sshll.u32 %s4851_s20, 4  ;;  %s4614_s6 = int_to_ptr.vmem [resolvable:$false] %s4613_s6 }
  0x73   : > { %s4615_s14 = scalar_lea.vmem %s4614_s6, 8192  ;;  %p4616_p8 = scmp.lt.s32.totalorder %s5094_s18, %s4614_s6 }
  0x74   : > { %p4611_p3 = pnand %p4609_p0, %p5063_p13  ;;  %p4617_p10 = scmp.lt.s32.totalorder %s4615_s14, %s4608_s22 }
  0x76   : > { %p4612_p7 = pneg %p4611_p3  ;;  %p4618_p1 = por %p4617_p10, %p4616_p8 }
  0x78   : > { %p4619_p4 = pnand %p4618_p1, %p4612_p7 }
  0x7a   : > { %4622 = shalt.err (!%p4619_p4)
}
  0x7b   : > { %s5858_s26 = smov 128   ;;  %s5859_s21 = smov 8  }
  0x7c   : > { %4034 = dma.hbm_to_vmem [thread:$0]  (!%p5045_p11), %s5092_s24, 4096, %s5094_s18, %s5057_s15, %s5858_s26, %s5858_s26, %s5859_s21  }
  0x7d   : > { %s5860_s16 = sshll.u32 %s5042_s30, 9  ;;  %s4854_s10 = smov [#allocation7]  }
  0x7e   : > { %s503_s5 = sshll.u32 %s4854_s10, 4  ;;  %s5861_s23 = sshll.u32 %s4843_s27, 13  ;;  %s504_s5 = int_to_ptr.vmem [resolvable:$true] %s503_s5 }
  0x7f   : > { %s5893_s2 = sld [smem:[#allocation27_spill]]  ;;  %p5894_p5 = scmp.ne.s32.totalorder %s5887_s12, 0 }
  0x85   : > { %s4623_s6 = scalar_lea.hbm %s5893_s2, 16 }
  0x86   : > { %p4624_p2 = scmp.ne.s32.totalorder %s5893_s2, %s4623_s6  ;;  %p4630_p12 = scmp.lt.u32.totalorder %s4623_s6, %s5893_s2 }
  0x88   : > { %p4626_p6 = pnand %p4624_p2, %p5894_p5 }
  0x8a   : > { %p4627_p9 = pneg %p4626_p6 }
  0x8c   : > { %p4632_p0 = pnand %p4630_p12, %p4627_p9 }
  0x8e   : > { %4635 = shalt.err (!%p4632_p0)
}
  0x8f   : > { %s4636_s24 = scalar_lea.vmem %s504_s5, 16  ;;  %s4643_s18 = scalar_lea.vmem %s504_s5, 32 }
  0x90   : > { %p4637_p3 = scmp.ne.s32.totalorder %s504_s5, %s4636_s24  ;;  %p4644_p10 = scmp.lt.s32.totalorder %s504_s5, %s504_s5 }
  0x91   : > { %p4645_p1 = scmp.lt.s32.totalorder %s4643_s18, %s4636_s24 }
  0x92   : > { %p4639_p7 = pnand %p4637_p3, %p5894_p5 }
  0x93   : > { %p4646_p4 = por %p4645_p1, %p4644_p10 }
  0x94   : > { %p4640_p8 = pneg %p4639_p7 }
  0x96   : > { %p4647_p11 = pnand %p4646_p4, %p4640_p8 }
  0x98   : > { %4650 = shalt.err (!%p4647_p11)
}
  0x99   : > { %p5895_p2 = scmp.ne.s32.totalorder %s5883_s19, 0  ;;  %s5146_s22 = scalar_lea.hbm %s5833_s11, %s5861_s23 }
  0x9a   : > { %s610_s20 = scalar_lea.vmem [#allocation14], %s5860_s16  ;;  %s4651_s14 = scalar_lea.hbm %s5146_s22, 8192 }
  0x9b   : > { %4021 = dma.hbm_to_vmem [thread:$0]  (!%p5895_p2), %s5893_s2, 16, %s504_s5, [#allocation8]  }
  0x9c   : > { %s617_s6 = sshll.u32 %s610_s20, 4  ;;  %p4652_p11 = scmp.ne.s32.totalorder %s5146_s22, %s4651_s14  ;;  %s5150_s6 = int_to_ptr.vmem [resolvable:$true] %s617_s6 }
  0x9d   : > { %s4656_s18 = scalar_lea.hbm %s5833_s11, 16384  ;;  %p4657_p12 = scmp.lt.u32.totalorder %s5146_s22, %s5833_s11 }
  0x9e   : > { %p4654_p6 = pnand %p4652_p11, %p5063_p13  ;;  %p4658_p0 = scmp.lt.u32.totalorder %s4656_s18, %s4651_s14 }
  0x9f   : > { %p4660_p7 = scmp.lt.u32.totalorder %s4651_s14, %s5146_s22 }
  0xa0   : > { %p4655_p9 = pneg %p4654_p6  ;;  %p4659_p3 = por %p4658_p0, %p4657_p12 }
  0xa2   : > { %p4661_p8 = por %p4660_p7, %p4659_p3 }
  0xa4   : > { %p4662_p10 = pnand %p4661_p8, %p4655_p9 }
  0xa6   : > { %4665 = shalt.err (!%p4662_p10)
}
  0xa7   : > { %s4666_s8 = scalar_lea.vmem %s5150_s6, 8192  ;;  %s4855_s9 = smov [#allocation14]  }
  0xa8   : > { %p4667_p1 = scmp.ne.s32.totalorder %s5150_s6, %s4666_s8  ;;  %s4671_s20 = sshll.u32 %s4855_s9, 4  ;;  %s4672_s20 = int_to_ptr.vmem [resolvable:$false] %s4671_s20 }
  0xa9   : > { %s4673_s5 = scalar_lea.vmem %s4672_s20, 16384  ;;  %p4674_p6 = scmp.lt.s32.totalorder %s5150_s6, %s4672_s20 }
  0xaa   : > { %p4669_p4 = pnand %p4667_p1, %p5063_p13  ;;  %p4675_p2 = scmp.lt.s32.totalorder %s4673_s5, %s4666_s8 }
  0xac   : > { %p4670_p11 = pneg %p4669_p4  ;;  %p4676_p12 = por %p4675_p2, %p4674_p6 }
  0xae   : > { %p4677_p0 = pnand %p4676_p12, %p4670_p11 }
  0xb0   : > { %4680 = shalt.err (!%p4677_p0)
}
  0xb1   : > { %p5896_p9 = scmp.ne.s32.totalorder %s5889_s1, 0  ;;  %s5897_s14 = smov 16  }
  0xb2   : > { %s5898_s24 = smov 256   ;;  %s4856_s18 = smov [#allocation9]  }
  0xb3   : > { %4037 = dma.hbm_to_vmem [thread:$0]  (!%p5896_p9), %s5146_s22, 8192, %s5150_s6, %s5057_s15, %s5898_s24, %s5898_s24, %s5897_s14  }
  0xb4   : > { %s514_s7 = sshll.u32 %s4856_s18, 4  ;;  %s4857_s10 = smov [#allocation10]   ;;  %s515_s7 = int_to_ptr.vmem [resolvable:$true] %s514_s7 }
  0xb5   : > { %s525_s9 = sshll.u32 %s4857_s10, 4  ;;  %s5899_s3 = sld [smem:[#allocation28_spill]]  ;;  %s526_s9 = int_to_ptr.vmem [resolvable:$true] %s525_s9 }
  0xbb   : > { %s4681_s5 = scalar_lea.hbm %s5899_s3, 32 }
  0xbc   : > { %p4682_p2 = scmp.ne.s32.totalorder %s5899_s3, %s4681_s5  ;;  %p4688_p8 = scmp.lt.u32.totalorder %s4681_s5, %s5899_s3 }
  0xbe   : > { %p4684_p3 = pnand %p4682_p2, %p5894_p5 }
  0xc0   : > { %p4685_p7 = pneg %p4684_p3 }
  0xc2   : > { %p4690_p10 = pnand %p4688_p8, %p4685_p7 }
  0xc4   : > { %4693 = shalt.err (!%p4690_p10)
}
  0xc5   : > { %s4694_s22 = scalar_lea.vmem %s515_s7, 32  ;;  %p4702_p6 = scmp.lt.s32.totalorder %s515_s7, %s515_s7 }
  0xc6   : > { %p4695_p1 = scmp.ne.s32.totalorder %s515_s7, %s4694_s22  ;;  %p4703_p12 = scmp.lt.s32.totalorder %s4694_s22, %s4694_s22 }
  0xc8   : > { %p4697_p4 = pnand %p4695_p1, %p5894_p5  ;;  %p4704_p0 = por %p4703_p12, %p4702_p6 }
  0xca   : > { %p4698_p11 = pneg %p4697_p4 }
  0xcc   : > { %p4705_p9 = pnand %p4704_p0, %p4698_p11 }
  0xce   : > { %4708 = shalt.err (!%p4705_p9)
}
  0xcf   : > { %p5900_p2 = scmp.ne.s32.totalorder %s5883_s19, 0  ;;  %s5901_s4 = sld [smem:[#allocation29_spill]] }
  0xd1   : > { %4024 = dma.hbm_to_vmem [thread:$0]  (!%p5900_p2), %s5899_s3, 32, %s515_s7, [#allocation8]  }
  0xd5   : > { %s4709_s6 = scalar_lea.hbm %s5901_s4, 32 }
  0xd6   : > { %p4710_p3 = scmp.ne.s32.totalorder %s5901_s4, %s4709_s6  ;;  %p4716_p9 = scmp.lt.u32.totalorder %s4709_s6, %s5901_s4 }
  0xd8   : > { %p4712_p7 = pnand %p4710_p3, %p5894_p5 }
  0xda   : > { %p4713_p8 = pneg %p4712_p7 }
  0xdc   : > { %p4718_p10 = pnand %p4716_p9, %p4713_p8 }
  0xde   : > { %4721 = shalt.err (!%p4718_p10)
}
  0xdf   : > { %s4722_s20 = scalar_lea.vmem %s526_s9, 32  ;;  %p4730_p6 = scmp.lt.s32.totalorder %s526_s9, %s526_s9 }
  0xe0   : > { %p4723_p1 = scmp.ne.s32.totalorder %s526_s9, %s4722_s20  ;;  %p4731_p12 = scmp.lt.s32.totalorder %s4722_s20, %s4722_s20 }
  0xe2   : > { %p4725_p4 = pnand %p4723_p1, %p5894_p5  ;;  %p4732_p0 = por %p4731_p12, %p4730_p6 }
  0xe4   : > { %p4726_p11 = pneg %p4725_p4 }
  0xe6   : > { %p4733_p13 = pnand %p4732_p0, %p4726_p11 }
  0xe8   : > { %4736 = shalt.err (!%p4733_p13)
}
  0xe9   : > { %4027 = dma.hbm_to_vmem [thread:$0]  (!%p5900_p2), %s5901_s4, 32, %s526_s9, [#allocation11]  }
  0xea   : > { %s5902_s5 = sshll.u32 %s4843_s27, 13  ;;  %s5903_s21 = sshll.u32 %s5042_s30, 9 }
  0xeb   : > { %s5218_s12 = scalar_lea.hbm %s5835_s13, %s5902_s5  ;;  %s638_s16 = scalar_lea.vmem [#allocation15], %s5903_s21 }
  0xec   : > { %s645_s19 = sshll.u32 %s638_s16, 4  ;;  %s4737_s23 = scalar_lea.hbm %s5218_s12, 8192  ;;  %s5222_s19 = int_to_ptr.vmem [resolvable:$true] %s645_s19 }
  0xed   : > { %p4738_p13 = scmp.ne.s32.totalorder %s5218_s12, %s4737_s23  ;;  %p5904_p5 = scmp.ne.s32.totalorder %s5891_s17, 0 }
  0xee   : > { %s4742_s6 = scalar_lea.hbm %s5835_s13, 16384  ;;  %p4743_p7 = scmp.lt.u32.totalorder %s5218_s12, %s5835_s13 }
  0xef   : > { %p4740_p3 = pnand %p4738_p13, %p5904_p5  ;;  %p4744_p8 = scmp.lt.u32.totalorder %s4742_s6, %s4737_s23 }
  0xf0   : > { %p4746_p10 = scmp.lt.u32.totalorder %s4737_s23, %s5218_s12 }
  0xf1   : > { %p4741_p2 = pneg %p4740_p3  ;;  %p4745_p9 = por %p4744_p8, %p4743_p7 }
  0xf3   : > { %p4747_p1 = por %p4746_p10, %p4745_p9 }
  0xf5   : > { %p4748_p4 = pnand %p4747_p1, %p4741_p2 }
  0xf7   : > { %4751 = shalt.err (!%p4748_p4)
}
  0xf8   : > { %s4752_s30 = scalar_lea.vmem %s5222_s19, 8192  ;;  %s4858_s18 = smov [#allocation15]  }
  0xf9   : > { %p4753_p11 = scmp.ne.s32.totalorder %s5222_s19, %s4752_s30  ;;  %s4757_s10 = sshll.u32 %s4858_s18, 4  ;;  %s4758_s10 = int_to_ptr.vmem [resolvable:$false] %s4757_s10 }
  0xfa   : > { %s4759_s20 = scalar_lea.vmem %s4758_s10, 16384  ;;  %p4760_p0 = scmp.lt.s32.totalorder %s5222_s19, %s4758_s10 }
  0xfb   : > { %p4755_p6 = pnand %p4753_p11, %p5904_p5  ;;  %p4761_p13 = scmp.lt.s32.totalorder %s4759_s20, %s4752_s30 }
  0xfd   : > { %p4756_p12 = pneg %p4755_p6  ;;  %p4762_p3 = por %p4761_p13, %p4760_p0 }
  0xff   : > { %p4763_p7 = pnand %p4762_p3, %p4756_p12 }
 0x101   : > { %4766 = shalt.err (!%p4763_p7)
}
 0x102   : > { %p5905_p2 = scmp.ne.s32.totalorder %s5889_s1, 0  ;;  %s5906_s7 = smov 8  }
 0x103   : > { %s5907_s8 = smov 128   ;;  %p5908_p5 = scmp.ne.s32.totalorder %s5882_s0, 0 }
 0x104   : > { %4040 = dma.hbm_to_vmem [thread:$0]  (!%p5905_p2), %s5218_s12, 8192, %s5222_s19, %s5057_s15, %s5907_s8, %s5907_s8, %s5906_s7  }
 0x105   : > { %678 = sbr.rel (%p5908_p5) target bundleno = 3145 (0xc49), region = 88  ;;  %p5909_p8 = scmp.eq.s32.totalorder (!%p5908_p5), %s4975_s28, 0 }
 0x10c   : > { %4810 = dma.done.wait (%p5909_p8), [#allocation5], 512   ;;  %p5910_p9 = pmov %p5909_p8 }
 0x10d   : > { %p5911_p10 = pmov %p5909_p8 }
 0x10e   : > { %4812 = vsyncadd (%p5910_p9), [#allocation5], 4294966784 }
 0x10f   : > { %4814 = dma.done.wait (%p5911_p10), [#allocation8], 48   ;;  %p5912_p1 = pmov %p5909_p8 }
 0x111   : > { %4816 = vsyncadd (%p5912_p1), [#allocation8], 4294967248  ;;  %p5913_p4 = pmov %p5912_p1 }
 0x112   : > { %p5914_p11 = pmov %p5912_p1 }
 0x113   : > { %4818 = dma.done.wait (%p5913_p4), [#allocation11], 32  }
 0x114   : > { %4820 = vsyncadd (%p5914_p11), [#allocation11], 4294967264  ;;  %s696_s17 = sand.u32 1, %s4975_s28   ;;  %s698_s0 = sand.u32 1, %s4835_s25  }
 0x115   : > { %s3985_s1 = smul.u32 768, %s698_s0  ;;  %s697_s15 = scalar_lea.sflag [#allocation5], %s696_s17 }
 0x116   : > { %p5915_p6 = scmp.ne.s32.totalorder %s5881_s29, 0 }
 0x117   : > { %s5265_s5 = scalar_lea.vmem [#allocation12], %s3985_s1 }
 0x118   : > { %4822 = dma.done.wait (%p5915_p6), %s697_s15, 32768  }
 0x119   : > { %4824 = vsyncadd (%p5915_p6), %s697_s15, 4294934528  ;;  %s3661_s22 = sshll.u32 %s698_s0, 8  ;;  %s3662_s26 = sshll.u32 %s698_s0, 9 }
 0x11a   : > { %p820_p12 = scmp.lt.s32.totalorder %s4975_s28, 1  ;;  %s5918_s10 = sld [smem:[#allocation31_spill]] }
 0x11b   : > { %s5919_s17 = sld [smem:[#allocation35_spill]]  ;;  %s5920_s23 = sld [smem:[#allocation37_spill]] }
 0x11c   : > { %s821_s12 = scalar_select %p820_p12, %s4975_s28, 1 }
 0x11d   : > { %s5921_s29 = sld [smem:[#allocation36_spill]]  ;;  %s5922_s14 = sld [smem:[#allocation38_spill]] }
 0x11e   : > { %s3986_s21 = smul.u32 6, %s821_s12  ;;  %s5273_s16 = sshll.u32 %s821_s12, 1 }
 0x11f   : > { %s3667_s1 = sshll.u32 %s821_s12, 2  ;;  %s5309_s7 = scalar_lea.vmem [#allocation13], %s3661_s22 }
 0x120   : > { %s5286_s20 = scalar_lea.vmem %s5918_s10, %s3986_s21  ;;  %s5923_s10 = sld [smem:[#allocation39_spill]] }
 0x121   : > { %s835_s0 = scalar_lea.vmem %s5919_s17, %s5273_s16  ;;  %s843_s2 = scalar_lea.vmem %s5920_s23, %s5273_s16 }
 0x122   : > { %s5311_s12 = scalar_lea.vmem [#allocation14], %s3662_s26  ;;  %s5313_s8 = scalar_lea.vmem [#allocation15], %s3662_s26 }
 0x123   : > { %s5299_s4 = scalar_lea.vmem %s5921_s29, %s3667_s1  ;;  %s847_s30 = scalar_lea.vmem %s5922_s14, %s5273_s16 }
 0x124   : > { %p5924_p0 = scmp.ne.s32.totalorder %s4975_s28, 0 }
 0x125   : > { %v857_v0 = vld [vmem:[#allocation4] sm:$0xff] (!%p5924_p0)  ;;  %v858_v1 = vld [vmem:[#allocation4 + $0x8] sm:$0xff] (!%p5924_p0)  ;;  %v859_v2 = vld [vmem:[#allocation4 + $0x10] sm:$0xff] (!%p5924_p0)  ;;  %s5925_s17 = sld [smem:[#allocation26_spill]] (!%p5924_p0)  ;;  %v4859_v7 = vmov (!%p5924_p0), 0   ;;  %vm947_vm1 = vcmask (!%p5924_p0), 130048   ;;  %v897_v29 = vlaneseq (!%p5924_p0) }
 0x126   : > { %s851_s24 = scalar_lea.vmem %s5923_s10, %s5273_s16  ;;  %856 = sbr.rel (%p5924_p0) target bundleno = 614 (0x266), region = 124  ;;  %v863_v3 = vadd.f32 (!%p5924_p0), %v858_v1, %v857_v0  ;;  %v860_v4 = vld [vmem:[#allocation4 + $0x18] sm:$0xff] (!%p5924_p0)  ;;  %4102 = vset.pattern.permute.xlu1 (!%p5924_p0), %v4859_v7  ;;  %4101 = vset.pattern.permute.xlu0 (!%p5924_p0), %v4859_v7  ;;  %v3672_v23 = vld [vmem:[#allocation7] ss:$0 sm:$0xff] (!%p5924_p0)  ;;  %v4860_v25 = vmov (!%p5924_p0), -1e+30  }
 0x127   : > { %v866_v5 = vadd.f32 (!%p5924_p0), %v860_v4, %v859_v2  ;;  %v898_v33 = vshrl.u32 (!%p5924_p0), %v897_v29, 7  ;;  %v861_v39 = vld [vmem:[#allocation9] sm:$0x3] (!%p5924_p0)  ;;  %v862_v40 = vld [vmem:[#allocation10] sm:$0x3] (!%p5924_p0) }
 0x128   : > { %864 = vadd.xlane.f32.xlu0 (!%p5924_p0), %v863_v3 }
 0x129   : > { %v899_v36 = vsub.s32 (!%p5924_p0), 0, %v898_v33  ;;  %v903_v37 = vsub.s32 (!%p5924_p0), 1, %v898_v33 }
 0x12b   : > { %v930_v6 = vld [vmem:[%s5925_s17] sm:$0xff] (!%p5924_p0)  ;;  %v931_v22 = vld [vmem:[%s5925_s17 + $0x8] sm:$0xff] (!%p5924_p0)  ;;  %v900_v41 = vrot.slane (!%p5924_p0), %v861_v39, %v899_v36  ;;  %v904_v42 = vrot.slane (!%p5924_p0), %v861_v39, %v903_v37  ;;  %v915_v44 = vrot.slane (!%p5924_p0), %v862_v40, %v899_v36  ;;  %v919_v45 = vrot.slane (!%p5924_p0), %v862_v40, %v903_v37 }
 0x12c   : > { %867 = vadd.xlane.f32.xlu0 (!%p5924_p0), %v866_v5 }
 0x142   : > { %934 = vperm.xlu0 %4101, %v930_v6  }
 0x1b5   : > { %v865_v8 = vpop.xlane.xlu0 %864 }
 0x1b6   : > { %v870_v9 = vmul.f32 0.00390625, %v865_v8 }
 0x1b8   : > { %v872_v10 = vsub.f32 %v857_v0, %v870_v9  ;;  %v873_v11 = vsub.f32 %v858_v1, %v870_v9 }
 0x1b9   : > { %v868_v12 = vpop.xlane.xlu0 %867 }
 0x1ba   : > { %v871_v13 = vmul.f32 0.00390625, %v868_v12  ;;  %v876_v14 = vmul.f32 %v872_v10, %v872_v10  ;;  %v877_v15 = vmul.f32 %v873_v11, %v873_v11 }
 0x1bc   : > { %v874_v16 = vsub.f32 %v859_v2, %v871_v13  ;;  %v875_v17 = vsub.f32 %v860_v4, %v871_v13  ;;  %v880_v18 = vadd.f32 %v877_v15, %v876_v14 }
 0x1be   : > { %881 = vadd.xlane.f32.xlu1 %v880_v18  ;;  %v878_v19 = vmul.f32 %v874_v16, %v874_v16  ;;  %v879_v20 = vmul.f32 %v875_v17, %v875_v17 }
 0x1c0   : > { %v883_v21 = vadd.f32 %v879_v20, %v878_v19 }
 0x1c1   : > { %v935_v24 = vpop.permute.xlu0 %934 }
 0x1c2   : > { %884 = vadd.xlane.f32.xlu1 %v883_v21  ;;  %vm943_vm0 = vcmp.eq.s32.totalorder %v935_v24, %v3672_v23 }
 0x1c3   : > { %v945_v26 = vsel %vm943_vm0, 0.0, %v4860_v25 }
 0x1c4   : > { %948 = vst.msk [vmem:[#allocation3] sm:$0xff] %vm947_vm1, %v945_v26 }
 0x1d3   : > { %937 = vperm.xlu1 %4102, %v931_v22  }
 0x24b   : > { %v882_v27 = vpop.xlane.xlu1 %881 }
 0x24c   : > { %v886_v28 = vmul.f32 0.00390625, %v882_v27 }
 0x24e   : > { %v888_v30 = vadd.f32 1e-05, %v886_v28 }
 0x24f   : > { %v885_v31 = vpop.xlane.xlu1 %884 }
 0x250   : > { %4103 = vrsqrt.f32 %v888_v30  ;;  %v887_v32 = vmul.f32 0.00390625, %v885_v31 }
 0x252   : > { %v889_v34 = vadd.f32 1e-05, %v887_v32 }
 0x253   : > { %v938_v35 = vpop.permute.xlu1 %937 }
 0x254   : > { %4105 = vrsqrt.f32 %v889_v34  ;;  %vm944_vm2 = vcmp.eq.s32.totalorder %v938_v35, %v3672_v23 }
 0x255   : > { %v946_v38 = vsel %vm944_vm2, 0.0, %v4860_v25 }
 0x256   : > { %949 = vst.msk [vmem:[#allocation3 + $0x8] sm:$0xff] %vm947_vm1, %v946_v38 }
 0x25a   : > { %v4104_v43 = vpop.eup %4103 }
 0x25b   : > { %v892_v46 = vmul.f32 %v4104_v43, %v872_v10  ;;  %v893_v47 = vmul.f32 %v4104_v43, %v873_v11 }
 0x25d   : > { %v907_v48 = vmul.f32 %v900_v41, %v892_v46  ;;  %v908_v49 = vmul.f32 %v904_v42, %v893_v47 }
 0x25e   : > { %v4106_v50 = vpop.eup %4105 }
 0x25f   : > { %v922_v51 = vadd.f32 %v915_v44, %v907_v48  ;;  %v923_v52 = vadd.f32 %v919_v45, %v908_v49  ;;  %v894_v53 = vmul.f32 %v4106_v50, %v874_v16  ;;  %v895_v54 = vmul.f32 %v4106_v50, %v875_v17 }
 0x261   : > { %926 = vst [vmem:[#allocation2] sm:$0xff] %v922_v51  ;;  %927 = vst [vmem:[#allocation2 + $0x8] sm:$0xff] %v923_v52  ;;  %v909_v55 = vmul.f32 %v900_v41, %v894_v53  ;;  %v910_v56 = vmul.f32 %v904_v42, %v895_v54 }
 0x263   : > { %v924_v57 = vadd.f32 %v915_v44, %v909_v55  ;;  %v925_v58 = vadd.f32 %v919_v45, %v910_v56 }
 0x265   : > { %928 = vst [vmem:[#allocation2 + $0x10] sm:$0xff] %v924_v57  ;;  %929 = vst [vmem:[#allocation2 + $0x18] sm:$0xff] %v925_v58 }
 0x266 PF: > { %v4107_v59 = vld [vmem:[%s5265_s5 + $0x4] ss:$24 sps:$4 sm:$0xff]   ;;  %v4109_v60 = vld [vmem:[%s5265_s5] ss:$24 sps:$4 sm:$0xff]   ;;  %v4110_v61 = vld [vmem:[%s5265_s5 + $0x34] ss:$24 sps:$4 sm:$0xff]  }
 0x267   : > { %1564 = vmatprep.subr.bf16.mxu1 %v4107_v59  ;;  %v4112_v62 = vld [vmem:[%s5265_s5 + $0x30] ss:$24 sps:$4 sm:$0xff]   ;;  %v4113_v63 = vld [vmem:[%s5265_s5 + $0x64] ss:$24 sps:$4 sm:$0xff]   ;;  %v4115_v0 = vld [vmem:[%s5265_s5 + $0x60] ss:$24 sps:$4 sm:$0xff]  }
 0x268   : > { %1565 = vmatpush1.bf16.msra.mxu1 %v4109_v60  ;;  %v4116_v1 = vld [vmem:[%s5265_s5 + $0x94] ss:$24 sps:$4 sm:$0xff]   ;;  %v4118_v2 = vld [vmem:[%s5265_s5 + $0x90] ss:$24 sps:$4 sm:$0xff]   ;;  %v4119_v3 = vld [vmem:[%s5265_s5 + $0xc4] ss:$24 sps:$4 sm:$0xff]  }
 0x269   : > { %1566 = vmatprep.subr.bf16.mxu1 %v4110_v61  ;;  %v4121_v4 = vld [vmem:[%s5265_s5 + $0xc0] ss:$24 sps:$4 sm:$0xff]   ;;  %v4122_v5 = vld [vmem:[%s5265_s5 + $0xf4] ss:$24 sps:$4 sm:$0xff]   ;;  %v4124_v6 = vld [vmem:[%s5265_s5 + $0xf0] ss:$24 sps:$4 sm:$0xff]  }
 0x26a   : > { %v4125_v7 = vld [vmem:[%s5265_s5 + $0x124] ss:$24 sps:$4 sm:$0xff]   ;;  %v951_v8 = vld [vmem:[#allocation2 + $0x8] sm:$0xff]  ;;  %v950_v30 = vld [vmem:[#allocation2] sm:$0xff]  ;;  %vm4862_vm3 = vmmov 0   ;;  %vm1743_vm4 = vcmask 130048  }
 0x26b   : > { %v4127_v11 = vld [vmem:[%s5265_s5 + $0x120] ss:$24 sps:$4 sm:$0xff]   ;;  %v4128_v12 = vld [vmem:[%s5265_s5 + $0x154] ss:$24 sps:$4 sm:$0xff]   ;;  %v4130_v13 = vld [vmem:[%s5265_s5 + $0x150] ss:$24 sps:$4 sm:$0xff]  }
 0x26c   : > { %1567 = vmatpush1.bf16.msra.mxu1 %v4112_v62  ;;  %v953_v9 = vld [vmem:[#allocation2 + $0x18] sm:$0xff]  ;;  %v4134_v16 = vld [vmem:[%s5265_s5 + $0x1b4] ss:$24 sps:$4 sm:$0xff]   ;;  %v952_v31 = vld [vmem:[#allocation2 + $0x10] sm:$0xff]  ;;  %s5926_s1 = sld [smem:[#allocation33_spill]]  ;;  %s5928_s27 = sld [smem:[#allocation34_spill]] }
 0x26d   : > { %1568 = vmatprep.subr.bf16.mxu1 %v4113_v63  ;;  %v955_v10 = vpack.c.bf16 %v953_v9, %v951_v8  ;;  %v4131_v14 = vld [vmem:[%s5265_s5 + $0x184] ss:$24 sps:$4 sm:$0xff]   ;;  %v4133_v15 = vld [vmem:[%s5265_s5 + $0x180] ss:$24 sps:$4 sm:$0xff]   ;;  %v4136_v17 = vld [vmem:[%s5265_s5 + $0x1b0] ss:$24 sps:$4 sm:$0xff]   ;;  %v5359_v34 = vpack.c.bf16 %v952_v31, %v950_v30 }
 0x26e   : > { %v4137_v18 = vld [vmem:[%s5265_s5 + $0x1e4] ss:$24 sps:$4 sm:$0xff]   ;;  %v4139_v19 = vld [vmem:[%s5265_s5 + $0x1e0] ss:$24 sps:$4 sm:$0xff]   ;;  %v4140_v20 = vld [vmem:[%s5265_s5 + $0x214] ss:$24 sps:$4 sm:$0xff]  }
 0x26f   : > { %1596 = vmatprep.mubr.bf16.mxu1 %v955_v10  ;;  %1682 = vmatprep.mubr.bf16.mxu0 %v955_v10  ;;  %v4142_v21 = vld [vmem:[%s5265_s5 + $0x210] ss:$24 sps:$4 sm:$0xff]   ;;  %v4143_v22 = vld [vmem:[%s5265_s5 + $0x244] ss:$24 sps:$4 sm:$0xff]   ;;  %v4145_v23 = vld [vmem:[%s5265_s5 + $0x240] ss:$24 sps:$4 sm:$0xff]  }
 0x270   : > { %1569 = vmatpush1.bf16.msra.mxu1 %v4115_v0  ;;  %v4146_v24 = vld [vmem:[%s5265_s5 + $0x274] ss:$24 sps:$4 sm:$0xff]   ;;  %v4148_v25 = vld [vmem:[%s5265_s5 + $0x270] ss:$24 sps:$4 sm:$0xff]   ;;  %v4149_v26 = vld [vmem:[%s5265_s5 + $0x2a4] ss:$24 sps:$4 sm:$0xff]  }
 0x271   : > { %1570 = vmatprep.subr.bf16.mxu1 %v4116_v1  ;;  %v4151_v27 = vld [vmem:[%s5265_s5 + $0x2a0] ss:$24 sps:$4 sm:$0xff]   ;;  %v4152_v28 = vld [vmem:[%s5265_s5 + $0x2d4] ss:$24 sps:$4 sm:$0xff]   ;;  %v4154_v29 = vld [vmem:[%s5265_s5 + $0x2d0] ss:$24 sps:$4 sm:$0xff]  }
 0x272   : > { %v4157_v32 = vld [vmem:[%s5265_s5 + $0xc] ss:$24 sps:$4 sm:$0xff]   ;;  %v4155_v33 = vld [vmem:[%s5265_s5 + $0x8] ss:$24 sps:$4 sm:$0xff]   ;;  %v4160_v35 = vld [vmem:[%s5265_s5 + $0x3c] ss:$24 sps:$4 sm:$0xff]   ;;  %s5927_s15 = scalar_lea.vmem %s5926_s1, %s5273_s16  ;;  %s5929_s9 = scalar_lea.vmem %s5928_s27, %s5273_s16 }
 0x273   : > { %v4158_v36 = vld [vmem:[%s5265_s5 + $0x38] ss:$24 sps:$4 sm:$0xff]   ;;  %v4163_v37 = vld [vmem:[%s5265_s5 + $0x6c] ss:$24 sps:$4 sm:$0xff]   ;;  %v4161_v38 = vld [vmem:[%s5265_s5 + $0x68] ss:$24 sps:$4 sm:$0xff]  }
 0x274   : > { %1571 = vmatpush1.bf16.msra.mxu1 %v4118_v2  ;;  %v4166_v39 = vld [vmem:[%s5265_s5 + $0x9c] ss:$24 sps:$4 sm:$0xff]   ;;  %v4164_v40 = vld [vmem:[%s5265_s5 + $0x98] ss:$24 sps:$4 sm:$0xff]   ;;  %v4169_v41 = vld [vmem:[%s5265_s5 + $0xcc] ss:$24 sps:$4 sm:$0xff]  }
 0x275   : > { %1572 = vmatprep.subr.bf16.mxu1 %v4119_v3  ;;  %v4167_v42 = vld [vmem:[%s5265_s5 + $0xc8] ss:$24 sps:$4 sm:$0xff]   ;;  %v4172_v43 = vld [vmem:[%s5265_s5 + $0xfc] ss:$24 sps:$4 sm:$0xff]   ;;  %v4170_v44 = vld [vmem:[%s5265_s5 + $0xf8] ss:$24 sps:$4 sm:$0xff]  }
 0x276   : > { %v4175_v45 = vld [vmem:[%s5265_s5 + $0x12c] ss:$24 sps:$4 sm:$0xff]   ;;  %v4173_v46 = vld [vmem:[%s5265_s5 + $0x128] ss:$24 sps:$4 sm:$0xff]   ;;  %v4178_v47 = vld [vmem:[%s5265_s5 + $0x15c] ss:$24 sps:$4 sm:$0xff]  }
 0x277   : > { %v4176_v48 = vld [vmem:[%s5265_s5 + $0x158] ss:$24 sps:$4 sm:$0xff]   ;;  %v4181_v49 = vld [vmem:[%s5265_s5 + $0x18c] ss:$24 sps:$4 sm:$0xff]   ;;  %v4179_v50 = vld [vmem:[%s5265_s5 + $0x188] ss:$24 sps:$4 sm:$0xff]  }
 0x278   : > { %1573 = vmatpush1.bf16.msra.mxu1 %v4121_v4  ;;  %v4184_v51 = vld [vmem:[%s5265_s5 + $0x1bc] ss:$24 sps:$4 sm:$0xff]   ;;  %v4182_v52 = vld [vmem:[%s5265_s5 + $0x1b8] ss:$24 sps:$4 sm:$0xff]   ;;  %v4187_v53 = vld [vmem:[%s5265_s5 + $0x1ec] ss:$24 sps:$4 sm:$0xff]  }
 0x279   : > { %1574 = vmatprep.subr.bf16.mxu1 %v4122_v5  ;;  %v4185_v54 = vld [vmem:[%s5265_s5 + $0x1e8] ss:$24 sps:$4 sm:$0xff]   ;;  %v4190_v55 = vld [vmem:[%s5265_s5 + $0x21c] ss:$24 sps:$4 sm:$0xff]   ;;  %v4188_v56 = vld [vmem:[%s5265_s5 + $0x218] ss:$24 sps:$4 sm:$0xff]  }
 0x27a   : > { %v4193_v57 = vld [vmem:[%s5265_s5 + $0x24c] ss:$24 sps:$4 sm:$0xff]   ;;  %v4191_v58 = vld [vmem:[%s5265_s5 + $0x248] ss:$24 sps:$4 sm:$0xff]   ;;  %v4196_v59 = vld [vmem:[%s5265_s5 + $0x27c] ss:$24 sps:$4 sm:$0xff]  }
 0x27b   : > { %v4194_v60 = vld [vmem:[%s5265_s5 + $0x278] ss:$24 sps:$4 sm:$0xff]   ;;  %v4199_v61 = vld [vmem:[%s5265_s5 + $0x2ac] ss:$24 sps:$4 sm:$0xff]   ;;  %v4197_v62 = vld [vmem:[%s5265_s5 + $0x2a8] ss:$24 sps:$4 sm:$0xff]  }
 0x27c   : > { %1575 = vmatpush1.bf16.msra.mxu1 %v4124_v6  ;;  %v4202_v63 = vld [vmem:[%s5265_s5 + $0x2dc] ss:$24 sps:$4 sm:$0xff]   ;;  %v4200_v0 = vld [vmem:[%s5265_s5 + $0x2d8] ss:$24 sps:$4 sm:$0xff]   ;;  %p3931_p13 = scmp.ne.s32.totalorder %s4975_s28, 1 }
 0x27d   : > { %1576 = vmatprep.subr.bf16.mxu1 %v4125_v7  ;;  %v4203_v1 = vld [vmem:[%s5265_s5 + $0x14] ss:$24 sps:$4 sm:$0xff]   ;;  %v4205_v2 = vld [vmem:[%s5265_s5 + $0x10] ss:$24 sps:$4 sm:$0xff]   ;;  %v4206_v3 = vld [vmem:[%s5265_s5 + $0x44] ss:$24 sps:$4 sm:$0xff]  }
 0x27e   : > { %1650 = vmatprep.subr.bf16.mxu0 %v4203_v1  ;;  %v4208_v4 = vld [vmem:[%s5265_s5 + $0x40] ss:$24 sps:$4 sm:$0xff]   ;;  %v4209_v5 = vld [vmem:[%s5265_s5 + $0x74] ss:$24 sps:$4 sm:$0xff]   ;;  %v4211_v6 = vld [vmem:[%s5265_s5 + $0x70] ss:$24 sps:$4 sm:$0xff]  }
 0x27f   : > { %1651 = vmatpush1.bf16.msra.mxu0 %v4205_v2  ;;  %v4212_v7 = vld [vmem:[%s5265_s5 + $0xa4] ss:$24 sps:$4 sm:$0xff]   ;;  %v4214_v8 = vld [vmem:[%s5265_s5 + $0xa0] ss:$24 sps:$4 sm:$0xff]   ;;  %v4215_v9 = vld [vmem:[%s5265_s5 + $0xd4] ss:$24 sps:$4 sm:$0xff]  }
 0x280   : > { %1577 = vmatpush1.bf16.msra.mxu1 %v4127_v11  ;;  %1652 = vmatprep.subr.bf16.mxu0 %v4206_v3  ;;  %v4218_v11 = vld [vmem:[%s5265_s5 + $0x104] ss:$24 sps:$4 sm:$0xff]   ;;  %v4247_v30 = vld [vmem:[%s5265_s5 + $0x2b0] ss:$24 sps:$4 sm:$0xff]  }
 0x281   : > { %1578 = vmatprep.subr.bf16.mxu1 %v4128_v12  ;;  %v4220_v12 = vld [vmem:[%s5265_s5 + $0x100] ss:$24 sps:$4 sm:$0xff]   ;;  %v4248_v31 = vld [vmem:[%s5265_s5 + $0x2e4] ss:$24 sps:$4 sm:$0xff]  }
 0x283   : > { %1653 = vmatpush1.bf16.msra.mxu0 %v4208_v4 }
 0x284   : > { %1579 = vmatpush1.bf16.msra.mxu1 %v4130_v13  ;;  %1654 = vmatprep.subr.bf16.mxu0 %v4209_v5  ;;  %v4221_v13 = vld [vmem:[%s5265_s5 + $0x134] ss:$24 sps:$4 sm:$0xff]  }
 0x285   : > { %1580 = vmatprep.subr.bf16.mxu1 %v4131_v14  ;;  %v4223_v14 = vld [vmem:[%s5265_s5 + $0x130] ss:$24 sps:$4 sm:$0xff]  }
 0x287   : > { %1655 = vmatpush1.bf16.msra.mxu0 %v4211_v6 }
 0x288   : > { %1581 = vmatpush1.bf16.msra.mxu1 %v4133_v15  ;;  %1656 = vmatprep.subr.bf16.mxu0 %v4212_v7  ;;  %v4224_v15 = vld [vmem:[%s5265_s5 + $0x164] ss:$24 sps:$4 sm:$0xff]  }
 0x289   : > { %1582 = vmatprep.subr.bf16.mxu1 %v4134_v16  ;;  %v4226_v16 = vld [vmem:[%s5265_s5 + $0x160] ss:$24 sps:$4 sm:$0xff]  }
 0x28b   : > { %1657 = vmatpush1.bf16.msra.mxu0 %v4214_v8 }
 0x28c   : > { %1583 = vmatpush1.bf16.msra.mxu1 %v4136_v17  ;;  %1658 = vmatprep.subr.bf16.mxu0 %v4215_v9  ;;  %v4227_v17 = vld [vmem:[%s5265_s5 + $0x194] ss:$24 sps:$4 sm:$0xff]  }
 0x28d   : > { %1584 = vmatprep.subr.bf16.mxu1 %v4137_v18  ;;  %v4229_v18 = vld [vmem:[%s5265_s5 + $0x190] ss:$24 sps:$4 sm:$0xff]  }
 0x290   : > { %1585 = vmatpush1.bf16.msra.mxu1 %v4139_v19  ;;  %v4230_v19 = vld [vmem:[%s5265_s5 + $0x1c4] ss:$24 sps:$4 sm:$0xff]  }
 0x291   : > { %1586 = vmatprep.subr.bf16.mxu1 %v4140_v20  ;;  %v4232_v20 = vld [vmem:[%s5265_s5 + $0x1c0] ss:$24 sps:$4 sm:$0xff]  }
 0x294   : > { %1587 = vmatpush1.bf16.msra.mxu1 %v4142_v21  ;;  %v4233_v21 = vld [vmem:[%s5265_s5 + $0x1f4] ss:$24 sps:$4 sm:$0xff]  }
 0x295   : > { %1588 = vmatprep.subr.bf16.mxu1 %v4143_v22  ;;  %v4235_v22 = vld [vmem:[%s5265_s5 + $0x1f0] ss:$24 sps:$4 sm:$0xff]  }
 0x298   : > { %1589 = vmatpush1.bf16.msra.mxu1 %v4145_v23  ;;  %v4236_v23 = vld [vmem:[%s5265_s5 + $0x224] ss:$24 sps:$4 sm:$0xff]  }
 0x299   : > { %1590 = vmatprep.subr.bf16.mxu1 %v4146_v24  ;;  %v4238_v24 = vld [vmem:[%s5265_s5 + $0x220] ss:$24 sps:$4 sm:$0xff]  }
 0x29c   : > { %1591 = vmatpush1.bf16.msra.mxu1 %v4148_v25  ;;  %v4239_v25 = vld [vmem:[%s5265_s5 + $0x254] ss:$24 sps:$4 sm:$0xff]  }
 0x29d   : > { %1592 = vmatprep.subr.bf16.mxu1 %v4149_v26  ;;  %v4241_v26 = vld [vmem:[%s5265_s5 + $0x250] ss:$24 sps:$4 sm:$0xff]  }
 0x2a0   : > { %1593 = vmatpush1.bf16.msra.mxu1 %v4151_v27  ;;  %v4242_v27 = vld [vmem:[%s5265_s5 + $0x284] ss:$24 sps:$4 sm:$0xff]  }
 0x2a1   : > { %1594 = vmatprep.subr.bf16.mxu1 %v4152_v28  ;;  %v4244_v28 = vld [vmem:[%s5265_s5 + $0x280] ss:$24 sps:$4 sm:$0xff]  }
 0x2a4   : > { %1595 = vmatpush1.bf16.msra.mxu1 %v4154_v29  ;;  %v4245_v29 = vld [vmem:[%s5265_s5 + $0x2b4] ss:$24 sps:$4 sm:$0xff]  }
 0x2a5   : > { %1607 = vmatprep.subr.bf16.mxu1 %v4157_v32  ;;  %v4250_v32 = vld [vmem:[%s5265_s5 + $0x2e0] ss:$24 sps:$4 sm:$0xff]  }
 0x2a7   : > { %1597 = vmatmul.mubr.bf16.vlgmr.msra.gmra.mrb[0].mxu1 %v5359_v34 }
 0x2a8   : > { %1608 = vmatpush1.bf16.msra.mxu1 %v4155_v33  ;;  %1639 = vmatprep.mubr.bf16.mxu1 %v955_v10  ;;  %v4217_v10 = vld [vmem:[%s5265_s5 + $0xd0] ss:$24 sps:$4 sm:$0xff]   ;;  %v4861_v33 = vmov 0.0  }
 0x2a9   : > { %1609 = vmatprep.subr.bf16.mxu1 %v4160_v35  ;;  %1659 = vmatpush1.bf16.msra.mxu0 %v4217_v10  ;;  %v1054_v35 = vlaneseq }
 0x2aa   : > { %1660 = vmatprep.subr.bf16.mxu0 %v4218_v11 }
 0x2ac   : > { %1610 = vmatpush1.bf16.msra.mxu1 %v4158_v36  ;;  %v5428_v36 = vshrl.u32 %v1054_v35, 7 }
 0x2ad   : > { %1611 = vmatprep.subr.bf16.mxu1 %v4163_v37  ;;  %1661 = vmatpush1.bf16.msra.mxu0 %v4220_v12 }
 0x2ae   : > { %1662 = vmatprep.subr.bf16.mxu0 %v4221_v13  ;;  %v5431_v37 = vsub.s32 0, %v5428_v36  ;;  %v1072_v1 = vsub.s32 4, %v5428_v36  ;;  %v1076_v2 = vsub.s32 5, %v5428_v36 }
 0x2b0   : > { %1612 = vmatpush1.bf16.msra.mxu1 %v4161_v38  ;;  %v1052_v38 = vld [vmem:[%s5286_s20] sm:$0x3f] }
 0x2b1   : > { %1613 = vmatprep.subr.bf16.mxu1 %v4166_v39  ;;  %1663 = vmatpush1.bf16.msra.mxu0 %v4223_v14  ;;  %v5435_v39 = vsub.s32 1, %v5428_v36  ;;  %v1073_v3 = vrot.slane %v1052_v38, %v1072_v1  ;;  %v1077_v4 = vrot.slane %v1052_v38, %v1076_v2 }
 0x2b2   : > { %1664 = vmatprep.subr.bf16.mxu0 %v4224_v15 }
 0x2b4   : > { %1614 = vmatpush1.bf16.msra.mxu1 %v4164_v40 }
 0x2b5   : > { %1615 = vmatprep.subr.bf16.mxu1 %v4169_v41  ;;  %1665 = vmatpush1.bf16.msra.mxu0 %v4226_v16  ;;  %v1061_v41 = vrot.slane %v1052_v38, %v5435_v39  ;;  %v1739_v16 = vld [vmem:[#allocation3] sm:$0xff] }
 0x2b6   : > { %1666 = vmatprep.subr.bf16.mxu0 %v4227_v17 }
 0x2b8   : > { %1616 = vmatpush1.bf16.msra.mxu1 %v4167_v42 }
 0x2b9   : > { %1617 = vmatprep.subr.bf16.mxu1 %v4172_v43  ;;  %1667 = vmatpush1.bf16.msra.mxu0 %v4229_v18 }
 0x2ba   : > { %1668 = vmatprep.subr.bf16.mxu0 %v4230_v19 }
 0x2bc   : > { %1618 = vmatpush1.bf16.msra.mxu1 %v4170_v44 }
 0x2bd   : > { %1619 = vmatprep.subr.bf16.mxu1 %v4175_v45  ;;  %1669 = vmatpush1.bf16.msra.mxu0 %v4232_v20 }
 0x2be   : > { %1670 = vmatprep.subr.bf16.mxu0 %v4233_v21 }
 0x2c0   : > { %1620 = vmatpush1.bf16.msra.mxu1 %v4173_v46 }
 0x2c1   : > { %1621 = vmatprep.subr.bf16.mxu1 %v4178_v47  ;;  %1671 = vmatpush1.bf16.msra.mxu0 %v4235_v22 }
 0x2c2   : > { %1672 = vmatprep.subr.bf16.mxu0 %v4236_v23  ;;  %v1740_v23 = vld [vmem:[#allocation3 + $0x8] sm:$0xff] }
 0x2c4   : > { %1622 = vmatpush1.bf16.msra.mxu1 %v4176_v48 }
 0x2c5   : > { %1623 = vmatprep.subr.bf16.mxu1 %v4181_v49  ;;  %1673 = vmatpush1.bf16.msra.mxu0 %v4238_v24 }
 0x2c6   : > { %1674 = vmatprep.subr.bf16.mxu0 %v4239_v25 }
 0x2c8   : > { %1624 = vmatpush1.bf16.msra.mxu1 %v4179_v50 }
 0x2c9   : > { %1625 = vmatprep.subr.bf16.mxu1 %v4184_v51  ;;  %1675 = vmatpush1.bf16.msra.mxu0 %v4241_v26  ;;  %v1064_v51 = vsub.s32 2, %v5428_v36 }
 0x2ca   : > { %1676 = vmatprep.subr.bf16.mxu0 %v4242_v27 }
 0x2cc   : > { %1626 = vmatpush1.bf16.msra.mxu1 %v4182_v52  ;;  %v1068_v52 = vsub.s32 3, %v5428_v36 }
 0x2cd   : > { %1627 = vmatprep.subr.bf16.mxu1 %v4187_v53  ;;  %1677 = vmatpush1.bf16.msra.mxu0 %v4244_v28  ;;  %v1065_v53 = vrot.slane %v1052_v38, %v1064_v51 }
 0x2ce   : > { %1678 = vmatprep.subr.bf16.mxu0 %v4245_v29 }
 0x2d0   : > { %1628 = vmatpush1.bf16.msra.mxu1 %v4185_v54 }
 0x2d1   : > { %1629 = vmatprep.subr.bf16.mxu1 %v4190_v55  ;;  %1679 = vmatpush1.bf16.msra.mxu0 %v4247_v30  ;;  %v1069_v55 = vrot.slane %v1052_v38, %v1068_v52 }
 0x2d2   : > { %1680 = vmatprep.subr.bf16.mxu0 %v4248_v31 }
 0x2d4   : > { %1630 = vmatpush1.bf16.msra.mxu1 %v4188_v56 }
 0x2d5   : > { %1631 = vmatprep.subr.bf16.mxu1 %v4193_v57  ;;  %1681 = vmatpush1.bf16.msra.mxu0 %v4250_v32 }
 0x2d6   : > { %3951 = vmatprep.subr.bf16.mxu0 %v4861_v33 }
 0x2d8   : > { %1632 = vmatpush1.bf16.msra.mxu1 %v4191_v58  ;;  %1683 = vmatmul.mubr.bf16.vlgmr.msra.gmra.mrb[0].mxu0 %v5359_v34 }
 0x2d9   : > { %1633 = vmatprep.subr.bf16.mxu1 %v4196_v59  ;;  %3953 = vmatprep.mubr.msk.bf16.mxu0 %vm4862_vm3, %v4861_v33 }
 0x2dc   : > { %1634 = vmatpush1.bf16.msra.mxu1 %v4194_v60 }
 0x2dd   : > { %1635 = vmatprep.subr.bf16.mxu1 %v4199_v61 }
 0x2e0   : > { %1636 = vmatpush1.bf16.msra.mxu1 %v4197_v62 }
 0x2e1   : > { %1637 = vmatprep.subr.bf16.mxu1 %v4202_v63 }
 0x2e4   : > { %1638 = vmatpush1.bf16.msra.mxu1 %v4200_v0 }
 0x2e5   : > { %3963 = vmatprep.subr.bf16.mxu1 %v4861_v33 }
 0x2e7   : > { %1640 = vmatmul.mubr.bf16.vlgmr.msra.gmra.mrb[4].mxu1 %v5359_v34  ;;  %v1057_v34 = vrot.slane %v1052_v38, %v5431_v37 }
 0x2e8   : > { %3965 = vmatprep.mubr.msk.bf16.mxu1 %vm4862_vm3, %v4861_v33 }
 0x37a   : > { %v1598_v40 = vpop.f32.mrb[0].mxu1 }
 0x37b   : > { %v1599_v42 = vadd.f32 %v1598_v40, %v1057_v34  ;;  %v1600_v43 = vpop.f32.mrb[1].mxu1 }
 0x37c   : > { %v1602_v44 = vpop.f32.mrb[2].mxu1  ;;  %v1601_v47 = vadd.f32 %v1600_v43, %v1061_v41 }
 0x37d   : > { %v1603_v45 = vadd.f32 %v1602_v44, %v1057_v34  ;;  %v1604_v46 = vpop.f32.mrb[3].mxu1 }
 0x37e   : > { %v1605_v48 = vadd.f32 %v1604_v46, %v1061_v41 }
 0x37f   : > { %v1693_v49 = vpack.c.bf16 %v1603_v45, %v1599_v42 }
 0x380   : > { %v1811_v50 = vpack.c.bf16 %v1605_v48, %v1601_v47 }
 0x3ab   : > { %v1684_v5 = vpop.f32.mrb[0].mxu0 }
 0x3ac   : > { %v1685_v6 = vadd.f32 %v1684_v5, %v1073_v3  ;;  %v1686_v7 = vpop.f32.mrb[1].mxu0 }
 0x3ad   : > { %v1687_v8 = vadd.f32 %v1686_v7, %v1077_v4  ;;  %v1688_v9 = vpop.f32.mrb[2].mxu0 }
 0x3ae   : > { %v1689_v10 = vadd.f32 %v1688_v9, %v1073_v3  ;;  %v1690_v11 = vpop.f32.mrb[3].mxu0 }
 0x3af   : > { %v1691_v12 = vadd.f32 %v1690_v11, %v1077_v4  ;;  %v4256_v11 = vld [vmem:[%s5309_s7 + $0x14] ss:$8 sps:$4 sm:$0xff]  }
 0x3b0   : > { %v1695_v13 = vpack.c.bf16 %v1689_v10, %v1685_v6 }
 0x3b1   : > { %v1813_v14 = vpack.c.bf16 %v1691_v12, %v1687_v8  ;;  %v4251_v8 = vld [vmem:[%s5309_s7] ss:$8 sps:$4 sm:$0xff]  }
 0x3ba   : > { %v1641_v54 = vpop.f32.mrb[4].mxu1 }
 0x3bb   : > { %v1643_v56 = vpop.f32.mrb[5].mxu1  ;;  %v1642_v58 = vadd.f32 %v1641_v54, %v1065_v53 }
 0x3bc   : > { %v1645_v57 = vpop.f32.mrb[6].mxu1  ;;  %v1644_v61 = vadd.f32 %v1643_v56, %v1069_v55 }
 0x3bd   : > { %v1646_v59 = vadd.f32 %v1645_v57, %v1065_v53  ;;  %v1647_v60 = vpop.f32.mrb[7].mxu1 }
 0x3be   : > { %v1648_v62 = vadd.f32 %v1647_v60, %v1069_v55 }
 0x3bf   : > { %v1694_v63 = vpack.c.bf16 %v1646_v59, %v1642_v58 }
 0x3c0   : > { %v1812_v0 = vpack.c.bf16 %v1648_v62, %v1644_v61  ;;  %v4253_v62 = vld [vmem:[%s5309_s7 + $0x4] ss:$8 sps:$4 sm:$0xff]  }
 0x3c1   : > { %3952 = vmatpush3.bf16.xpose.msra.mxu0 %v1694_v63 }
 0x3c2   : > { %3964 = vmatpush3.bf16.xpose.msra.mxu1 %v1812_v0  ;;  %3957 = vmatprep.subr.bf16.mxu0 %v4861_v33 }
 0x3c3   : > { %3969 = vmatprep.subr.bf16.mxu1 %v4861_v33 }
 0x3c8   : > { %3954 = vmatmul.mubr.bf16.vlgmr.msra.gmra.mrb[4].mxu0 %v1693_v49 }
 0x3c9   : > { %3966 = vmatmul.mubr.bf16.vlgmr.msra.gmra.mrb[8].mxu1 %v1811_v50  ;;  %3959 = vmatprep.mubr.msk.bf16.mxu0 %vm4862_vm3, %v4861_v33 }
 0x3ca   : > { %3971 = vmatprep.mubr.msk.bf16.mxu1 %vm4862_vm3, %v4861_v33  ;;  %3958 = vmatpush3.bf16.msra.mxu0 %v1695_v13 }
 0x3cb   : > { %3970 = vmatpush3.bf16.msra.mxu1 %v1813_v14 }
 0x3cc   : > { %2132 = vmatprep.subr.bf16.mxu1 %v4253_v62 }
 0x49b   : > { %v1730_v15 = vpop.f32.mrb[4].mxu0 }
 0x49c   : > { %v1737_v17 = vmul.f32 0.088388346, %v1730_v15  ;;  %v3955_v18 = vpop.f32.mrb[5].mxu0  ;;  %v1848_v19 = vpop.f32.mrb[8].mxu1  ;;  %v4254_v15 = vld [vmem:[%s5309_s7 + $0x10] ss:$8 sps:$4 sm:$0xff]  }
 0x49d   : > { %v1855_v20 = vmul.f32 0.088388346, %v1848_v19  ;;  %v1733_v21 = vpop.f32.mrb[6].mxu0  ;;  %v3967_v22 = vpop.f32.mrb[9].mxu1  ;;  %v4262_v18 = vld [vmem:[%s5309_s7 + $0x34] ss:$8 sps:$4 sm:$0xff]  }
 0x49e   : > { %v1738_v24 = vmul.f32 0.088388346, %v1733_v21  ;;  %v3956_v25 = vpop.f32.mrb[7].mxu0  ;;  %v1851_v26 = vpop.f32.mrb[10].mxu1  ;;  %v1741_v27 = vadd.f32 %v1739_v16, %v1737_v17  ;;  %v4257_v17 = vld [vmem:[%s5309_s7 + $0x20] ss:$8 sps:$4 sm:$0xff]  }
 0x49f   : > { %v1856_v28 = vmul.f32 0.088388346, %v1851_v26  ;;  %v3968_v29 = vpop.f32.mrb[11].mxu1  ;;  %v1857_v30 = vadd.f32 %v1855_v20, %v1739_v16  ;;  %v4259_v16 = vld [vmem:[%s5309_s7 + $0x24] ss:$8 sps:$4 sm:$0xff]  }
 0x4a0   : > { %v1744_v31 = vsel %vm1743_vm4, %v1741_v27, -inf  ;;  %v1742_v32 = vadd.f32 %v1740_v23, %v1738_v24  ;;  %v4260_v19 = vld [vmem:[%s5309_s7 + $0x30] ss:$8 sps:$4 sm:$0xff]   ;;  %v4265_v20 = vld [vmem:[%s5309_s7 + $0x44] ss:$8 sps:$4 sm:$0xff]  }
 0x4a1   : > { %1745 = vmax.xlane.f32.xlu1 %v1744_v31  ;;  %v1859_v33 = vsel %vm1743_vm4, %v1857_v30, -inf  ;;  %v1858_v35 = vadd.f32 %v1856_v28, %v1740_v23  ;;  %v4263_v21 = vld [vmem:[%s5309_s7 + $0x40] ss:$8 sps:$4 sm:$0xff]   ;;  %v4268_v22 = vld [vmem:[%s5309_s7 + $0x54] ss:$8 sps:$4 sm:$0xff]  }
 0x4a2   : > { %1860 = vmax.xlane.f32.xlu0 %v1859_v33  ;;  %v1747_v38 = vsel %vm1743_vm4, %v1742_v32, -inf  ;;  %v4266_v23 = vld [vmem:[%s5309_s7 + $0x50] ss:$8 sps:$4 sm:$0xff]   ;;  %v4271_v24 = vld [vmem:[%s5309_s7 + $0x64] ss:$8 sps:$4 sm:$0xff]  }
 0x4a3   : > { %v1862_v34 = vsel %vm1743_vm4, %v1858_v35, -inf  ;;  %v4269_v25 = vld [vmem:[%s5309_s7 + $0x60] ss:$8 sps:$4 sm:$0xff]   ;;  %v4274_v26 = vld [vmem:[%s5309_s7 + $0x74] ss:$8 sps:$4 sm:$0xff]  }
 0x4a4   : > { %v4277_v28 = vld [vmem:[%s5309_s7 + $0x84] ss:$8 sps:$4 sm:$0xff]   ;;  %v4275_v29 = vld [vmem:[%s5309_s7 + $0x80] ss:$8 sps:$4 sm:$0xff]   ;;  %v4278_v31 = vld [vmem:[%s5309_s7 + $0x90] ss:$8 sps:$4 sm:$0xff]  }
 0x4a5   : > { %1748 = vmax.xlane.f32.xlu1 %v1747_v38  ;;  %v4281_v33 = vld [vmem:[%s5309_s7 + $0xa0] ss:$8 sps:$4 sm:$0xff]   ;;  %v4284_v38 = vld [vmem:[%s5309_s7 + $0xb0] ss:$8 sps:$4 sm:$0xff]  }
 0x4a6   : > { %1863 = vmax.xlane.f32.xlu0 %v1862_v34  ;;  %v4289_v34 = vld [vmem:[%s5309_s7 + $0xc4] ss:$8 sps:$4 sm:$0xff]  }
 0x52e   : > { %v1746_v40 = vpop.xlane.xlu1 %1745 }
 0x52f   : > { %v1750_v41 = vsub.f32 %v1741_v27, %v1746_v40  ;;  %v1861_v42 = vpop.xlane.xlu0 %1860  ;;  %v4272_v27 = vld [vmem:[%s5309_s7 + $0x70] ss:$8 sps:$4 sm:$0xff]   ;;  %v4287_v40 = vld [vmem:[%s5309_s7 + $0xc0] ss:$8 sps:$4 sm:$0xff]  }
 0x530   : > { %v1865_v43 = vsub.f32 %v1857_v30, %v1861_v42  ;;  %v4280_v30 = vld [vmem:[%s5309_s7 + $0x94] ss:$8 sps:$4 sm:$0xff]   ;;  %v4290_v42 = vld [vmem:[%s5309_s7 + $0xd0] ss:$8 sps:$4 sm:$0xff]  }
 0x531   : > { %v1752_v44 = vmul.f32 1.442695, %v1750_v41  ;;  %v4292_v41 = vld [vmem:[%s5309_s7 + $0xd4] ss:$8 sps:$4 sm:$0xff]  }
 0x532   : > { %v1867_v45 = vmul.f32 1.442695, %v1865_v43  ;;  %v1749_v46 = vpop.xlane.xlu1 %1748  ;;  %v4295_v43 = vld [vmem:[%s5309_s7 + $0xe4] ss:$8 sps:$4 sm:$0xff]  }
 0x533   : > { %v1751_v47 = vsub.f32 %v1742_v32, %v1749_v46  ;;  %v1864_v48 = vpop.xlane.xlu0 %1863  ;;  %v4283_v32 = vld [vmem:[%s5309_s7 + $0xa4] ss:$8 sps:$4 sm:$0xff]   ;;  %v4296_v46 = vld [vmem:[%s5309_s7 + $0xf0] ss:$8 sps:$4 sm:$0xff]  }
 0x534   : > { %4491 = vpow2.f32 %v1867_v45  ;;  %v1866_v49 = vsub.f32 %v1858_v35, %v1864_v48  ;;  %v4286_v35 = vld [vmem:[%s5309_s7 + $0xb4] ss:$8 sps:$4 sm:$0xff]  }
 0x535   : > { %4493 = vpow2.f32 %v1752_v44  ;;  %v1754_v50 = vmul.f32 1.442695, %v1751_v47  ;;  %v4293_v44 = vld [vmem:[%s5309_s7 + $0xe0] ss:$8 sps:$4 sm:$0xff]   ;;  %v4298_v45 = vld [vmem:[%s5309_s7 + $0xf4] ss:$8 sps:$4 sm:$0xff]  }
 0x536   : > { %v1869_v53 = vmul.f32 1.442695, %v1866_v49 }
 0x538   : > { %4495 = vpow2.f32 %v1869_v53 }
 0x539   : > { %4497 = vpow2.f32 %v1754_v50 }
 0x53e   : > { %v4492_v54 = vpop.eup %4491 }
 0x53f   : > { %v1871_v55 = vsel %vm1743_vm4, %v4492_v54, 0.0  ;;  %v4494_v56 = vpop.eup %4493 }
 0x540   : > { %1872 = vadd.xlane.f32.xlu0 %v1871_v55  ;;  %v1756_v58 = vsel %vm1743_vm4, %v4494_v56, 0.0 }
 0x542   : > { %v4496_v57 = vpop.eup %4495 }
 0x543   : > { %v1874_v59 = vsel %vm1743_vm4, %v4496_v57, 0.0  ;;  %v4498_v60 = vpop.eup %4497 }
 0x544   : > { %1757 = vadd.xlane.f32.xlu0 %v1756_v58  ;;  %1875 = vadd.xlane.f32.xlu1 %v1874_v59  ;;  %v1759_v61 = vsel %vm1743_vm4, %v4498_v60, 0.0  ;;  %v1960_v59 = vld [vmem:[%s5927_s15] sm:$0x3] }
 0x548   : > { %1760 = vadd.xlane.f32.xlu1 %v1759_v61  ;;  %v1969_v61 = vrot.slane %v1960_v59, %v5435_v39 }
 0x5cd   : > { %v1873_v63 = vpop.xlane.xlu0 %1872 }
 0x5ce   : > { %4499 = vrcp.f32 %v1873_v63 }
 0x5d1   : > { %v1758_v0 = vpop.xlane.xlu0 %1757  ;;  %v1876_v1 = vpop.xlane.xlu1 %1875 }
 0x5d2   : > { %4501 = vrcp.f32 %v1876_v1 }
 0x5d3   : > { %4503 = vrcp.f32 %v1758_v0 }
 0x5d5   : > { %v1761_v2 = vpop.xlane.xlu1 %1760 }
 0x5d6   : > { %4505 = vrcp.f32 %v1761_v2 }
 0x5d8   : > { %v4500_v3 = vpop.eup %4499 }
 0x5d9   : > { %v1879_v6 = vmul.f32 %v4500_v3, %v4492_v54  ;;  %v4531_v3 = vld [vmem:[#allocation2] sm:$0xff] }
 0x5dc   : > { %v4502_v4 = vpop.eup %4501 }
 0x5dd   : > { %v4504_v5 = vpop.eup %4503  ;;  %v1880_v7 = vmul.f32 %v4502_v4, %v4496_v57 }
 0x5de   : > { %v1764_v12 = vmul.f32 %v4504_v5, %v4494_v56 }
 0x5df   : > { %v1881_v10 = vpack.c.bf16 %v1880_v7, %v1879_v6  ;;  %v4532_v7 = vld [vmem:[#allocation2 + $0x8] sm:$0xff] }
 0x5e0   : > { %v4506_v9 = vpop.eup %4505 }
 0x5e1   : > { %v1765_v13 = vmul.f32 %v4506_v9, %v4498_v60  ;;  %3972 = vmatmul.mubr.msk.bf16.vlgmr.msra.gmra.mrb[12].mxu1 %vm1743_vm4, %v1881_v10  ;;  %v1965_v60 = vrot.slane %v1960_v59, %v5431_v37  ;;  %v4533_v10 = vld [vmem:[#allocation2 + $0x10] sm:$0xff] }
 0x5e2   : > { %2133 = vmatpush1.bf16.msra.mxu1 %v4251_v8  ;;  %v4353_v59 = vld [vmem:[%s5311_s12 + $0x120] ss:$16 sps:$4 sm:$0xff]  }
 0x5e3   : > { %v1766_v14 = vpack.c.bf16 %v1765_v13, %v1764_v12  ;;  %2134 = vmatprep.subr.bf16.mxu1 %v4256_v11  ;;  %v4534_v12 = vld [vmem:[#allocation2 + $0x18] sm:$0xff] }
 0x5e5   : > { %3960 = vmatmul.mubr.msk.bf16.vlgmr.msra.gmra.mrb[8].mxu0 %vm1743_vm4, %v1766_v14 }
 0x5e6   : > { %2135 = vmatpush1.bf16.msra.mxu1 %v4254_v15 }
 0x5e7   : > { %2136 = vmatprep.subr.bf16.mxu1 %v4259_v16  ;;  %v4299_v16 = vld [vmem:[%s5311_s12] ss:$16 sps:$4 sm:$0xff]  }
 0x5ea   : > { %2137 = vmatpush1.bf16.msra.mxu1 %v4257_v17  ;;  %v4301_v17 = vld [vmem:[%s5311_s12 + $0x4] ss:$16 sps:$4 sm:$0xff]  }
 0x5eb   : > { %2138 = vmatprep.subr.bf16.mxu1 %v4262_v18  ;;  %v4302_v18 = vld [vmem:[%s5311_s12 + $0x8] ss:$16 sps:$4 sm:$0xff]   ;;  %2652 = vmatprep.subr.bf16.mxu0 %v4301_v17  ;;  %v4365_v17 = vld [vmem:[%s5311_s12 + $0x160] ss:$16 sps:$4 sm:$0xff]  }
 0x5ec   : > { %2653 = vmatpush1.bf16.msra.mxu0 %v4299_v16  ;;  %v4370_v16 = vld [vmem:[%s5311_s12 + $0x16c] ss:$16 sps:$4 sm:$0xff]  }
 0x5ee   : > { %2139 = vmatpush1.bf16.msra.mxu1 %v4260_v19  ;;  %v4304_v19 = vld [vmem:[%s5311_s12 + $0xc] ss:$16 sps:$4 sm:$0xff]  }
 0x5ef   : > { %2140 = vmatprep.subr.bf16.mxu1 %v4265_v20  ;;  %v4307_v20 = vld [vmem:[%s5311_s12 + $0x24] ss:$16 sps:$4 sm:$0xff]  }
 0x5f0   : > { %2654 = vmatprep.subr.bf16.mxu0 %v4307_v20  ;;  %v4376_v20 = vld [vmem:[%s5311_s12 + $0x18c] ss:$16 sps:$4 sm:$0xff]  }
 0x5f2   : > { %2141 = vmatpush1.bf16.msra.mxu1 %v4263_v21  ;;  %v4310_v21 = vld [vmem:[%s5311_s12 + $0x2c] ss:$16 sps:$4 sm:$0xff]  }
 0x5f3   : > { %2142 = vmatprep.subr.bf16.mxu1 %v4268_v22  ;;  %v4305_v22 = vld [vmem:[%s5311_s12 + $0x20] ss:$16 sps:$4 sm:$0xff]  }
 0x5f4   : > { %2655 = vmatpush1.bf16.msra.mxu0 %v4305_v22  ;;  %v4374_v22 = vld [vmem:[%s5311_s12 + $0x188] ss:$16 sps:$4 sm:$0xff]  }
 0x5f6   : > { %2143 = vmatpush1.bf16.msra.mxu1 %v4266_v23  ;;  %v4308_v23 = vld [vmem:[%s5311_s12 + $0x28] ss:$16 sps:$4 sm:$0xff]  }
 0x5f7   : > { %2144 = vmatprep.subr.bf16.mxu1 %v4271_v24  ;;  %v4313_v24 = vld [vmem:[%s5311_s12 + $0x44] ss:$16 sps:$4 sm:$0xff]  }
 0x5f8   : > { %2656 = vmatprep.subr.bf16.mxu0 %v4313_v24  ;;  %v4382_v24 = vld [vmem:[%s5311_s12 + $0x1ac] ss:$16 sps:$4 sm:$0xff]  }
 0x5fa   : > { %2145 = vmatpush1.bf16.msra.mxu1 %v4269_v25  ;;  %v4316_v25 = vld [vmem:[%s5311_s12 + $0x4c] ss:$16 sps:$4 sm:$0xff]  }
 0x5fb   : > { %2146 = vmatprep.subr.bf16.mxu1 %v4274_v26  ;;  %v4311_v26 = vld [vmem:[%s5311_s12 + $0x40] ss:$16 sps:$4 sm:$0xff]  }
 0x5fc   : > { %2657 = vmatpush1.bf16.msra.mxu0 %v4311_v26  ;;  %v4380_v26 = vld [vmem:[%s5311_s12 + $0x1a8] ss:$16 sps:$4 sm:$0xff]  }
 0x5fe   : > { %2147 = vmatpush1.bf16.msra.mxu1 %v4272_v27  ;;  %v4314_v27 = vld [vmem:[%s5311_s12 + $0x48] ss:$16 sps:$4 sm:$0xff]  }
 0x5ff   : > { %2148 = vmatprep.subr.bf16.mxu1 %v4277_v28  ;;  %v4319_v28 = vld [vmem:[%s5311_s12 + $0x64] ss:$16 sps:$4 sm:$0xff]  }
 0x600   : > { %2658 = vmatprep.subr.bf16.mxu0 %v4319_v28  ;;  %v4385_v28 = vld [vmem:[%s5311_s12 + $0x1c4] ss:$16 sps:$4 sm:$0xff]  }
 0x602   : > { %2149 = vmatpush1.bf16.msra.mxu1 %v4275_v29  ;;  %v4322_v29 = vld [vmem:[%s5311_s12 + $0x6c] ss:$16 sps:$4 sm:$0xff]  }
 0x603   : > { %2150 = vmatprep.subr.bf16.mxu1 %v4280_v30  ;;  %v4317_v30 = vld [vmem:[%s5311_s12 + $0x60] ss:$16 sps:$4 sm:$0xff]  }
 0x604   : > { %2659 = vmatpush1.bf16.msra.mxu0 %v4317_v30  ;;  %v4388_v30 = vld [vmem:[%s5311_s12 + $0x1cc] ss:$16 sps:$4 sm:$0xff]  }
 0x606   : > { %2151 = vmatpush1.bf16.msra.mxu1 %v4278_v31  ;;  %v4320_v31 = vld [vmem:[%s5311_s12 + $0x68] ss:$16 sps:$4 sm:$0xff]  }
 0x607   : > { %2152 = vmatprep.subr.bf16.mxu1 %v4283_v32  ;;  %v4325_v32 = vld [vmem:[%s5311_s12 + $0x84] ss:$16 sps:$4 sm:$0xff]  }
 0x608   : > { %2660 = vmatprep.subr.bf16.mxu0 %v4325_v32  ;;  %v4394_v32 = vld [vmem:[%s5311_s12 + $0x1ec] ss:$16 sps:$4 sm:$0xff]  }
 0x60a   : > { %2153 = vmatpush1.bf16.msra.mxu1 %v4281_v33  ;;  %v4328_v33 = vld [vmem:[%s5311_s12 + $0x8c] ss:$16 sps:$4 sm:$0xff]  }
 0x60b   : > { %2154 = vmatprep.subr.bf16.mxu1 %v4286_v35  ;;  %v4323_v35 = vld [vmem:[%s5311_s12 + $0x80] ss:$16 sps:$4 sm:$0xff]  }
 0x60c   : > { %2661 = vmatpush1.bf16.msra.mxu0 %v4323_v35  ;;  %v4392_v35 = vld [vmem:[%s5311_s12 + $0x1e8] ss:$16 sps:$4 sm:$0xff]  }
 0x60e   : > { %2155 = vmatpush1.bf16.msra.mxu1 %v4284_v38  ;;  %v4326_v38 = vld [vmem:[%s5311_s12 + $0x88] ss:$16 sps:$4 sm:$0xff]  }
 0x60f   : > { %2156 = vmatprep.subr.bf16.mxu1 %v4289_v34  ;;  %v4331_v34 = vld [vmem:[%s5311_s12 + $0xa4] ss:$16 sps:$4 sm:$0xff]  }
 0x610   : > { %2662 = vmatprep.subr.bf16.mxu0 %v4331_v34 }
 0x612   : > { %2157 = vmatpush1.bf16.msra.mxu1 %v4287_v40  ;;  %v4334_v40 = vld [vmem:[%s5311_s12 + $0xac] ss:$16 sps:$4 sm:$0xff]  }
 0x613   : > { %2158 = vmatprep.subr.bf16.mxu1 %v4292_v41  ;;  %v4329_v41 = vld [vmem:[%s5311_s12 + $0xa0] ss:$16 sps:$4 sm:$0xff]  }
 0x614   : > { %2663 = vmatpush1.bf16.msra.mxu0 %v4329_v41 }
 0x616   : > { %2159 = vmatpush1.bf16.msra.mxu1 %v4290_v42  ;;  %v4332_v42 = vld [vmem:[%s5311_s12 + $0xa8] ss:$16 sps:$4 sm:$0xff]  }
 0x617   : > { %2160 = vmatprep.subr.bf16.mxu1 %v4295_v43  ;;  %v4337_v43 = vld [vmem:[%s5311_s12 + $0xc4] ss:$16 sps:$4 sm:$0xff]  }
 0x618   : > { %2664 = vmatprep.subr.bf16.mxu0 %v4337_v43 }
 0x61a   : > { %2161 = vmatpush1.bf16.msra.mxu1 %v4293_v44  ;;  %v4340_v44 = vld [vmem:[%s5311_s12 + $0xcc] ss:$16 sps:$4 sm:$0xff]  }
 0x61b   : > { %2162 = vmatprep.subr.bf16.mxu1 %v4298_v45  ;;  %v4335_v45 = vld [vmem:[%s5311_s12 + $0xc0] ss:$16 sps:$4 sm:$0xff]  }
 0x61c   : > { %2665 = vmatpush1.bf16.msra.mxu0 %v4335_v45  ;;  %v2179_v45 = vld [vmem:[%s5929_s9] sm:$0x3] }
 0x61e   : > { %2163 = vmatpush1.bf16.msra.mxu1 %v4296_v46  ;;  %v4338_v46 = vld [vmem:[%s5311_s12 + $0xc8] ss:$16 sps:$4 sm:$0xff]  }
 0x61f   : > { %2695 = vmatprep.subr.bf16.mxu1 %v4304_v19  ;;  %v4373_v19 = vld [vmem:[%s5311_s12 + $0x184] ss:$16 sps:$4 sm:$0xff]  }
 0x6b4   : > { %v1919_v47 = vpop.f32.mrb[12].mxu1 }
 0x6b5   : > { %v3973_v48 = vpop.f32.mrb[13].mxu1 }
 0x6b6   : > { %v1922_v49 = vpop.f32.mrb[14].mxu1  ;;  %v4346_v48 = vld [vmem:[%s5311_s12 + $0xec] ss:$16 sps:$4 sm:$0xff]  }
 0x6b7   : > { %v1927_v50 = vpack.c.bf16 %v1922_v49, %v1919_v47  ;;  %v3974_v53 = vpop.f32.mrb[15].mxu1  ;;  %v4343_v47 = vld [vmem:[%s5311_s12 + $0xe4] ss:$16 sps:$4 sm:$0xff]   ;;  %v4341_v49 = vld [vmem:[%s5311_s12 + $0xe0] ss:$16 sps:$4 sm:$0xff]  }
 0x6b8   : > { %v1804_v54 = vpop.f32.mrb[8].mxu0  ;;  %2666 = vmatprep.subr.bf16.mxu0 %v4343_v47  ;;  %v4349_v53 = vld [vmem:[%s5311_s12 + $0x104] ss:$16 sps:$4 sm:$0xff]   ;;  %v2218_v47 = vrot.slane %v2179_v45, %v5431_v37 }
 0x6b9   : > { %v3961_v55 = vpop.f32.mrb[9].mxu0  ;;  %2164 = vmatprep.mubr.bf16.mxu1 %v1927_v50  ;;  %v4344_v50 = vld [vmem:[%s5311_s12 + $0xe8] ss:$16 sps:$4 sm:$0xff]   ;;  %2667 = vmatpush1.bf16.msra.mxu0 %v4341_v49 }
 0x6ba   : > { %v1807_v56 = vpop.f32.mrb[10].mxu0  ;;  %v4347_v55 = vld [vmem:[%s5311_s12 + $0x100] ss:$16 sps:$4 sm:$0xff]   ;;  %2668 = vmatprep.subr.bf16.mxu0 %v4349_v53 }
 0x6bb   : > { %v1926_v57 = vpack.c.bf16 %v1807_v56, %v1804_v54  ;;  %v3962_v58 = vpop.f32.mrb[11].mxu0  ;;  %v4352_v54 = vld [vmem:[%s5311_s12 + $0x10c] ss:$16 sps:$4 sm:$0xff]   ;;  %v4350_v56 = vld [vmem:[%s5311_s12 + $0x108] ss:$16 sps:$4 sm:$0xff]  }
 0x6bc   : > { %v4358_v58 = vld [vmem:[%s5311_s12 + $0x12c] ss:$16 sps:$4 sm:$0xff]  }
 0x6bd   : > { %2165 = vmatmul.mubr.bf16.vlgmr.msra.gmra.mrb[16].mxu1 %v1926_v57  ;;  %v4355_v57 = vld [vmem:[%s5311_s12 + $0x124] ss:$16 sps:$4 sm:$0xff]   ;;  %2669 = vmatpush1.bf16.msra.mxu0 %v4347_v55 }
 0x6be   : > { %2696 = vmatpush1.bf16.msra.mxu1 %v4302_v18  ;;  %2670 = vmatprep.subr.bf16.mxu0 %v4355_v57  ;;  %v4368_v18 = vld [vmem:[%s5311_s12 + $0x168] ss:$16 sps:$4 sm:$0xff]  }
 0x6bf   : > { %2697 = vmatprep.subr.bf16.mxu1 %v4310_v21  ;;  %v4371_v21 = vld [vmem:[%s5311_s12 + $0x180] ss:$16 sps:$4 sm:$0xff]  }
 0x6c1   : > { %2671 = vmatpush1.bf16.msra.mxu0 %v4353_v59 }
 0x6c2   : > { %2698 = vmatpush1.bf16.msra.mxu1 %v4308_v23  ;;  %v4379_v23 = vld [vmem:[%s5311_s12 + $0x1a4] ss:$16 sps:$4 sm:$0xff]  }
 0x6c3   : > { %2699 = vmatprep.subr.bf16.mxu1 %v4316_v25  ;;  %v4377_v25 = vld [vmem:[%s5311_s12 + $0x1a0] ss:$16 sps:$4 sm:$0xff]  }
 0x6c6   : > { %2700 = vmatpush1.bf16.msra.mxu1 %v4314_v27  ;;  %v4383_v27 = vld [vmem:[%s5311_s12 + $0x1c0] ss:$16 sps:$4 sm:$0xff]  }
 0x6c7   : > { %2701 = vmatprep.subr.bf16.mxu1 %v4322_v29  ;;  %v4386_v29 = vld [vmem:[%s5311_s12 + $0x1c8] ss:$16 sps:$4 sm:$0xff]  }
 0x6ca   : > { %2702 = vmatpush1.bf16.msra.mxu1 %v4320_v31  ;;  %v4391_v31 = vld [vmem:[%s5311_s12 + $0x1e4] ss:$16 sps:$4 sm:$0xff]  }
 0x6cb   : > { %2703 = vmatprep.subr.bf16.mxu1 %v4328_v33  ;;  %v4389_v33 = vld [vmem:[%s5311_s12 + $0x1e0] ss:$16 sps:$4 sm:$0xff]  }
 0x6ce   : > { %2704 = vmatpush1.bf16.msra.mxu1 %v4326_v38  ;;  %v4397_v38 = vld [vmem:[%s5313_s8 + $0x4] ss:$8 sps:$4 sm:$0xff]  }
 0x6cf   : > { %2705 = vmatprep.subr.bf16.mxu1 %v4334_v40 }
 0x6d2   : > { %2706 = vmatpush1.bf16.msra.mxu1 %v4332_v42 }
 0x6d3   : > { %2707 = vmatprep.subr.bf16.mxu1 %v4340_v44 }
 0x6d6   : > { %2708 = vmatpush1.bf16.msra.mxu1 %v4338_v46  ;;  %v2180_v46 = vld [vmem:[%s835_s0] sm:$0x3] }
 0x6d7   : > { %2709 = vmatprep.subr.bf16.mxu1 %v4346_v48  ;;  %v2222_v48 = vrot.slane %v2179_v45, %v5435_v39  ;;  %v2233_v55 = vrot.slane %v2180_v46, %v5431_v37 }
 0x6da   : > { %2710 = vmatpush1.bf16.msra.mxu1 %v4344_v50 }
 0x6db   : > { %2711 = vmatprep.subr.bf16.mxu1 %v4352_v54 }
 0x6de   : > { %2712 = vmatpush1.bf16.msra.mxu1 %v4350_v56  ;;  %v2237_v56 = vrot.slane %v2180_v46, %v5435_v39 }
 0x6df   : > { %2713 = vmatprep.subr.bf16.mxu1 %v4358_v58 }
 0x790   : > { %v2166_v62 = vpop.f32.mrb[16].mxu1 }
 0x791   : > { %v2167_v63 = vadd.f32 %v2166_v62, %v1965_v60  ;;  %v2168_v0 = vpop.f32.mrb[17].mxu1 }
 0x792   : > { %v2169_v1 = vadd.f32 %v2168_v0, %v1969_v61  ;;  %v2170_v2 = vpop.f32.mrb[18].mxu1 }
 0x793   : > { %v5498_v4 = vadd.f32 %v4531_v3, %v2167_v63  ;;  %v2171_v5 = vadd.f32 %v2170_v2, %v1965_v60  ;;  %v2172_v6 = vpop.f32.mrb[19].mxu1  ;;  %v4356_v60 = vld [vmem:[%s5311_s12 + $0x128] ss:$16 sps:$4 sm:$0xff]  }
 0x794   : > { %v5500_v8 = vadd.f32 %v4532_v7, %v2169_v1  ;;  %v2173_v9 = vadd.f32 %v2172_v6, %v1969_v61  ;;  %2714 = vmatpush1.bf16.msra.mxu1 %v4356_v60 }
 0x795   : > { %v5502_v11 = vadd.f32 %v4533_v10, %v2171_v5 }
 0x796   : > { %v5504_v13 = vadd.f32 %v4534_v12, %v2173_v9  ;;  %v2181_v14 = vadd.f32 %v5500_v8, %v5498_v4  ;;  %v4364_v12 = vld [vmem:[%s5311_s12 + $0x14c] ss:$16 sps:$4 sm:$0xff]  }
 0x797   : > { %2715 = vmatprep.subr.bf16.mxu1 %v4364_v12  ;;  %v4409_v12 = vld [vmem:[%s5313_s8 + $0x44] ss:$8 sps:$4 sm:$0xff]  }
 0x798   : > { %2182 = vadd.xlane.f32.xlu0 %v2181_v14  ;;  %v2184_v15 = vadd.f32 %v5504_v13, %v5502_v11  ;;  %v4362_v14 = vld [vmem:[%s5311_s12 + $0x148] ss:$16 sps:$4 sm:$0xff]  }
 0x799   : > { %2716 = vmatpush1.bf16.msra.mxu1 %v4362_v14  ;;  %v4412_v14 = vld [vmem:[%s5313_s8 + $0x54] ss:$8 sps:$4 sm:$0xff]  }
 0x79a   : > { %2185 = vadd.xlane.f32.xlu1 %v2184_v15  ;;  %v4367_v15 = vld [vmem:[%s5311_s12 + $0x164] ss:$16 sps:$4 sm:$0xff]   ;;  %2717 = vmatprep.subr.bf16.mxu1 %v4370_v16 }
 0x79b   : > { %v4415_v16 = vld [vmem:[%s5313_s8 + $0x64] ss:$8 sps:$4 sm:$0xff]  }
 0x79d   : > { %2718 = vmatpush1.bf16.msra.mxu1 %v4368_v18  ;;  %v4418_v18 = vld [vmem:[%s5313_s8 + $0x74] ss:$8 sps:$4 sm:$0xff]  }
 0x79e   : > { %2719 = vmatprep.subr.bf16.mxu1 %v4376_v20  ;;  %v4421_v20 = vld [vmem:[%s5313_s8 + $0x84] ss:$8 sps:$4 sm:$0xff]  }
 0x7a1   : > { %2720 = vmatpush1.bf16.msra.mxu1 %v4374_v22  ;;  %v4424_v22 = vld [vmem:[%s5313_s8 + $0x94] ss:$8 sps:$4 sm:$0xff]  }
 0x7a2   : > { %2721 = vmatprep.subr.bf16.mxu1 %v4382_v24  ;;  %v4427_v24 = vld [vmem:[%s5313_s8 + $0xa4] ss:$8 sps:$4 sm:$0xff]  }
 0x7a5   : > { %2722 = vmatpush1.bf16.msra.mxu1 %v4380_v26  ;;  %v4430_v26 = vld [vmem:[%s5313_s8 + $0xb4] ss:$8 sps:$4 sm:$0xff]  }
 0x7a6   : > { %2723 = vmatprep.subr.bf16.mxu1 %v4388_v30  ;;  %v4436_v30 = vld [vmem:[%s5313_s8 + $0xd4] ss:$8 sps:$4 sm:$0xff]  }
 0x7a9   : > { %2724 = vmatpush1.bf16.msra.mxu1 %v4386_v29  ;;  %v4431_v29 = vld [vmem:[%s5313_s8 + $0xc0] ss:$8 sps:$4 sm:$0xff]  }
 0x7aa   : > { %2725 = vmatprep.subr.bf16.mxu1 %v4394_v32  ;;  %v4439_v32 = vld [vmem:[%s5313_s8 + $0xe4] ss:$8 sps:$4 sm:$0xff]  }
 0x7ad   : > { %2726 = vmatpush1.bf16.msra.mxu1 %v4392_v35  ;;  %v4440_v35 = vld [vmem:[%s5313_s8 + $0xf0] ss:$8 sps:$4 sm:$0xff]  }
 0x825   : > { %v2183_v61 = vpop.xlane.xlu0 %2182 }
 0x826   : > { %v2188_v62 = vmul.f32 0.00390625, %v2183_v61 }
 0x827   : > { %v2186_v63 = vpop.xlane.xlu1 %2185 }
 0x828   : > { %v5551_v0 = vsub.f32 %v5498_v4, %v2188_v62  ;;  %v5554_v1 = vsub.f32 %v5500_v8, %v2188_v62  ;;  %v2189_v2 = vmul.f32 0.00390625, %v2186_v63 }
 0x82a   : > { %v5557_v3 = vsub.f32 %v5502_v11, %v2189_v2  ;;  %v5560_v5 = vsub.f32 %v5504_v13, %v2189_v2  ;;  %v2194_v6 = vmul.f32 %v5551_v0, %v5551_v0  ;;  %v2195_v7 = vmul.f32 %v5554_v1, %v5554_v1  ;;  %v4361_v11 = vld [vmem:[%s5311_s12 + $0x144] ss:$16 sps:$4 sm:$0xff]   ;;  %v4359_v13 = vld [vmem:[%s5311_s12 + $0x140] ss:$16 sps:$4 sm:$0xff]  }
 0x82b   : > { %2672 = vmatprep.subr.bf16.mxu0 %v4361_v11  ;;  %v4404_v11 = vld [vmem:[%s5313_s8 + $0x30] ss:$8 sps:$4 sm:$0xff]  }
 0x82c   : > { %v2198_v4 = vadd.f32 %v2195_v7, %v2194_v6  ;;  %v2196_v8 = vmul.f32 %v5557_v3, %v5557_v3  ;;  %v2197_v9 = vmul.f32 %v5560_v5, %v5560_v5  ;;  %2673 = vmatpush1.bf16.msra.mxu0 %v4359_v13  ;;  %v4395_v6 = vld [vmem:[%s5313_s8] ss:$8 sps:$4 sm:$0xff]   ;;  %v4400_v7 = vld [vmem:[%s5313_s8 + $0x14] ss:$8 sps:$4 sm:$0xff]  }
 0x82d   : > { %2674 = vmatprep.subr.bf16.mxu0 %v4367_v15  ;;  %v4407_v13 = vld [vmem:[%s5313_s8 + $0x40] ss:$8 sps:$4 sm:$0xff]   ;;  %v4410_v15 = vld [vmem:[%s5313_s8 + $0x50] ss:$8 sps:$4 sm:$0xff]  }
 0x82e   : > { %2199 = vadd.xlane.f32.xlu0 %v2198_v4  ;;  %v2201_v10 = vadd.f32 %v2197_v9, %v2196_v8  ;;  %v4398_v4 = vld [vmem:[%s5313_s8 + $0x10] ss:$8 sps:$4 sm:$0xff]   ;;  %v4403_v8 = vld [vmem:[%s5313_s8 + $0x24] ss:$8 sps:$4 sm:$0xff]   ;;  %v4401_v9 = vld [vmem:[%s5313_s8 + $0x20] ss:$8 sps:$4 sm:$0xff]  }
 0x830   : > { %2202 = vadd.xlane.f32.xlu1 %v2201_v10  ;;  %2675 = vmatpush1.bf16.msra.mxu0 %v4365_v17  ;;  %v4406_v10 = vld [vmem:[%s5313_s8 + $0x34] ss:$8 sps:$4 sm:$0xff]   ;;  %v4413_v17 = vld [vmem:[%s5313_s8 + $0x60] ss:$8 sps:$4 sm:$0xff]  }
 0x831   : > { %2676 = vmatprep.subr.bf16.mxu0 %v4373_v19  ;;  %v4416_v19 = vld [vmem:[%s5313_s8 + $0x70] ss:$8 sps:$4 sm:$0xff]  }
 0x834   : > { %2677 = vmatpush1.bf16.msra.mxu0 %v4371_v21  ;;  %v4419_v21 = vld [vmem:[%s5313_s8 + $0x80] ss:$8 sps:$4 sm:$0xff]  }
 0x835   : > { %2678 = vmatprep.subr.bf16.mxu0 %v4379_v23  ;;  %v4422_v23 = vld [vmem:[%s5313_s8 + $0x90] ss:$8 sps:$4 sm:$0xff]  }
 0x838   : > { %2679 = vmatpush1.bf16.msra.mxu0 %v4377_v25  ;;  %v4425_v25 = vld [vmem:[%s5313_s8 + $0xa0] ss:$8 sps:$4 sm:$0xff]  }
 0x839   : > { %2680 = vmatprep.subr.bf16.mxu0 %v4385_v28  ;;  %v4433_v28 = vld [vmem:[%s5313_s8 + $0xc4] ss:$8 sps:$4 sm:$0xff]  }
 0x83c   : > { %2681 = vmatpush1.bf16.msra.mxu0 %v4383_v27  ;;  %v4428_v27 = vld [vmem:[%s5313_s8 + $0xb0] ss:$8 sps:$4 sm:$0xff]  }
 0x83d   : > { %2682 = vmatprep.subr.bf16.mxu0 %v4391_v31  ;;  %v4434_v31 = vld [vmem:[%s5313_s8 + $0xd0] ss:$8 sps:$4 sm:$0xff]  }
 0x840   : > { %2683 = vmatpush1.bf16.msra.mxu0 %v4389_v33  ;;  %v4437_v33 = vld [vmem:[%s5313_s8 + $0xe0] ss:$8 sps:$4 sm:$0xff]  }
 0x841   : > { %3210 = vmatprep.subr.bf16.mxu0 %v4397_v38  ;;  %v4442_v38 = vld [vmem:[%s5313_s8 + $0xf4] ss:$8 sps:$4 sm:$0xff]  }
 0x8bb   : > { %v2200_v34 = vpop.xlane.xlu0 %2199 }
 0x8bc   : > { %v2204_v40 = vmul.f32 0.00390625, %v2200_v34  ;;  %v4445_v34 = vld [vmem:[%s5313_s8 + $0x104] ss:$8 sps:$4 sm:$0xff]  }
 0x8bd   : > { %v2203_v41 = vpop.xlane.xlu1 %2202 }
 0x8be   : > { %v2206_v42 = vadd.f32 1e-05, %v2204_v40  ;;  %v2205_v43 = vmul.f32 0.00390625, %v2203_v41  ;;  %v2310_v40 = vld [vmem:[%s5299_s4] sm:$0xf] }
 0x8bf   : > { %v2315_v41 = vrot.slane %v2310_v40, %v5431_v37 }
 0x8c0   : > { %4507 = vrsqrt.f32 %v2206_v42  ;;  %v2207_v44 = vadd.f32 1e-05, %v2205_v43  ;;  %v2323_v42 = vrot.slane %v2310_v40, %v1064_v51  ;;  %v2319_v43 = vrot.slane %v2310_v40, %v5435_v39 }
 0x8c2   : > { %4509 = vrsqrt.f32 %v2207_v44  ;;  %v2327_v44 = vrot.slane %v2310_v40, %v1068_v52 }
 0x8ca   : > { %v4508_v49 = vpop.eup %4507 }
 0x8cb   : > { %v2210_v50 = vmul.f32 %v4508_v49, %v5551_v0  ;;  %v2211_v53 = vmul.f32 %v4508_v49, %v5554_v1 }
 0x8cc   : > { %v4510_v54 = vpop.eup %4509 }
 0x8cd   : > { %v2212_v57 = vmul.f32 %v4510_v54, %v5557_v3  ;;  %v2213_v58 = vmul.f32 %v4510_v54, %v5560_v5  ;;  %v2226_v59 = vmul.f32 %v2222_v48, %v2211_v53  ;;  %v2225_v60 = vmul.f32 %v2218_v47, %v2210_v50 }
 0x8cf   : > { %v2228_v61 = vmul.f32 %v2222_v48, %v2213_v58  ;;  %v2227_v62 = vmul.f32 %v2218_v47, %v2212_v57  ;;  %v5613_v63 = vadd.f32 %v2237_v56, %v2226_v59  ;;  %v5617_v1 = vadd.f32 %v2233_v55, %v2225_v60 }
 0x8d1   : > { %v5615_v0 = vadd.f32 %v2237_v56, %v2228_v61  ;;  %v5619_v2 = vadd.f32 %v2233_v55, %v2227_v62 }
 0x8d3   : > { %v2245_v3 = vpack.c.bf16 %v5615_v0, %v5613_v63  ;;  %v2244_v5 = vpack.c.bf16 %v5619_v2, %v5617_v1 }
 0x8d5   : > { %2684 = vmatprep.mubr.bf16.mxu0 %v2245_v3  ;;  %2727 = vmatprep.mubr.bf16.mxu1 %v2245_v3 }
 0x8d6   : > { %2685 = vmatmul.mubr.bf16.vlgmr.msra.gmra.mrb[12].mxu0 %v2244_v5  ;;  %2728 = vmatmul.mubr.bf16.vlgmr.msra.gmra.mrb[20].mxu1 %v2244_v5 }
 0x8d7   : > { %3211 = vmatpush1.bf16.msra.mxu0 %v4395_v6 }
 0x8d8   : > { %3212 = vmatprep.subr.bf16.mxu0 %v4400_v7 }
 0x8db   : > { %3213 = vmatpush1.bf16.msra.mxu0 %v4398_v4 }
 0x8dc   : > { %3214 = vmatprep.subr.bf16.mxu0 %v4403_v8 }
 0x8df   : > { %3215 = vmatpush1.bf16.msra.mxu0 %v4401_v9 }
 0x8e0   : > { %3216 = vmatprep.subr.bf16.mxu0 %v4406_v10 }
 0x8e3   : > { %3217 = vmatpush1.bf16.msra.mxu0 %v4404_v11 }
 0x8e4   : > { %3218 = vmatprep.subr.bf16.mxu0 %v4409_v12 }
 0x8e7   : > { %3219 = vmatpush1.bf16.msra.mxu0 %v4407_v13 }
 0x8e8   : > { %3220 = vmatprep.subr.bf16.mxu0 %v4412_v14 }
 0x8eb   : > { %3221 = vmatpush1.bf16.msra.mxu0 %v4410_v15 }
 0x8ec   : > { %3222 = vmatprep.subr.bf16.mxu0 %v4415_v16 }
 0x8ef   : > { %3223 = vmatpush1.bf16.msra.mxu0 %v4413_v17 }
 0x8f0   : > { %3224 = vmatprep.subr.bf16.mxu0 %v4418_v18 }
 0x8f3   : > { %3225 = vmatpush1.bf16.msra.mxu0 %v4416_v19 }
 0x8f4   : > { %3226 = vmatprep.subr.bf16.mxu0 %v4421_v20 }
 0x8f7   : > { %3227 = vmatpush1.bf16.msra.mxu0 %v4419_v21 }
 0x8f8   : > { %3228 = vmatprep.subr.bf16.mxu0 %v4424_v22 }
 0x8fb   : > { %3229 = vmatpush1.bf16.msra.mxu0 %v4422_v23 }
 0x8fc   : > { %3230 = vmatprep.subr.bf16.mxu0 %v4427_v24 }
 0x8ff   : > { %3231 = vmatpush1.bf16.msra.mxu0 %v4425_v25 }
 0x900   : > { %3232 = vmatprep.subr.bf16.mxu0 %v4430_v26 }
 0x903   : > { %3233 = vmatpush1.bf16.msra.mxu0 %v4428_v27 }
 0x904   : > { %3234 = vmatprep.subr.bf16.mxu0 %v4433_v28 }
 0x907   : > { %3235 = vmatpush1.bf16.msra.mxu0 %v4431_v29 }
 0x908   : > { %3236 = vmatprep.subr.bf16.mxu0 %v4436_v30 }
 0x90b   : > { %3237 = vmatpush1.bf16.msra.mxu0 %v4434_v31 }
 0x90c   : > { %3238 = vmatprep.subr.bf16.mxu0 %v4439_v32 }
 0x90f   : > { %3239 = vmatpush1.bf16.msra.mxu0 %v4437_v33 }
 0x910   : > { %3240 = vmatprep.subr.bf16.mxu0 %v4442_v38 }
 0x913   : > { %3241 = vmatpush1.bf16.msra.mxu0 %v4440_v35 }
 0x914   : > { %3253 = vmatprep.subr.bf16.mxu0 %v4445_v34 }
 0x9a9   : > { %v2686_v45 = vpop.f32.mrb[12].mxu0  ;;  %v2729_v46 = vpop.f32.mrb[20].mxu1 }
 0x9aa   : > { %v5664_v47 = vadd.f32 %v2686_v45, %v2315_v41  ;;  %v5666_v48 = vadd.f32 %v2729_v46, %v2323_v42  ;;  %v2688_v49 = vpop.f32.mrb[13].mxu0  ;;  %v2731_v50 = vpop.f32.mrb[21].mxu1 }
 0x9ab   : > { %v5668_v53 = vadd.f32 %v2688_v49, %v2319_v43  ;;  %v5670_v54 = vadd.f32 %v2731_v50, %v2327_v44  ;;  %v2690_v55 = vpop.f32.mrb[14].mxu0  ;;  %v2733_v56 = vpop.f32.mrb[22].mxu1 }
 0x9ac   : > { %v2738_v51 = vmul.f32 %v5664_v47, %v5664_v47  ;;  %v2740_v36 = vmul.f32 %v5666_v48, %v5666_v48  ;;  %v5676_v52 = vadd.f32 %v2690_v55, %v2315_v41  ;;  %v5678_v57 = vadd.f32 %v2733_v56, %v2323_v42  ;;  %v2692_v58 = vpop.f32.mrb[15].mxu0  ;;  %v2735_v59 = vpop.f32.mrb[23].mxu1 }
 0x9ad   : > { %v2739_v60 = vmul.f32 %v5668_v53, %v5668_v53  ;;  %v2741_v61 = vmul.f32 %v5670_v54, %v5670_v54  ;;  %v5684_v62 = vadd.f32 %v2692_v58, %v2319_v43  ;;  %v5686_v3 = vadd.f32 %v2735_v59, %v2327_v44 }
 0x9ae   : > { %v2746_v5 = vmul.f32 %v2738_v51, %v5664_v47  ;;  %v2748_v6 = vmul.f32 %v2740_v36, %v5666_v48  ;;  %v2742_v7 = vmul.f32 %v5676_v52, %v5676_v52  ;;  %v2744_v4 = vmul.f32 %v5678_v57, %v5678_v57 }
 0x9af   : > { %v2747_v8 = vmul.f32 %v2739_v60, %v5668_v53  ;;  %v2749_v9 = vmul.f32 %v2741_v61, %v5670_v54  ;;  %v2743_v10 = vmul.f32 %v5684_v62, %v5684_v62  ;;  %v2745_v11 = vmul.f32 %v5686_v3, %v5686_v3 }
 0x9b0   : > { %v2754_v12 = vmul.f32 0.044715, %v2746_v5  ;;  %v2756_v13 = vmul.f32 0.044715, %v2748_v6  ;;  %v2750_v14 = vmul.f32 %v2742_v7, %v5676_v52  ;;  %v2752_v15 = vmul.f32 %v2744_v4, %v5678_v57 }
 0x9b1   : > { %v2755_v16 = vmul.f32 0.044715, %v2747_v8  ;;  %v2757_v17 = vmul.f32 0.044715, %v2749_v9  ;;  %v2751_v18 = vmul.f32 %v2743_v10, %v5684_v62  ;;  %v2753_v19 = vmul.f32 %v2745_v11, %v5686_v3 }
 0x9b2   : > { %v2762_v20 = vadd.f32 %v2754_v12, %v5664_v47  ;;  %v2764_v21 = vadd.f32 %v2756_v13, %v5666_v48  ;;  %v2758_v22 = vmul.f32 0.044715, %v2750_v14  ;;  %v2760_v23 = vmul.f32 0.044715, %v2752_v15 }
 0x9b3   : > { %v2763_v24 = vadd.f32 %v2755_v16, %v5668_v53  ;;  %v2765_v25 = vadd.f32 %v2757_v17, %v5670_v54  ;;  %v2759_v26 = vmul.f32 0.044715, %v2751_v18  ;;  %v2761_v27 = vmul.f32 0.044715, %v2753_v19 }
 0x9b4   : > { %v2770_v28 = vmul.f32 0.7978846, %v2762_v20  ;;  %v2772_v29 = vmul.f32 0.7978846, %v2764_v21  ;;  %v2766_v30 = vadd.f32 %v2758_v22, %v5676_v52  ;;  %v2768_v31 = vadd.f32 %v2760_v23, %v5678_v57  ;;  %v4448_v23 = vld [vmem:[%s5313_s8 + $0x114] ss:$8 sps:$4 sm:$0xff]  }
 0x9b5   : > { %v2771_v32 = vmul.f32 0.7978846, %v2763_v24  ;;  %v2773_v33 = vmul.f32 0.7978846, %v2765_v25  ;;  %v2767_v35 = vadd.f32 %v2759_v26, %v5684_v62  ;;  %v2769_v38 = vadd.f32 %v2761_v27, %v5686_v3  ;;  %v4452_v24 = vld [vmem:[%s5313_s8 + $0x130] ss:$8 sps:$4 sm:$0xff]  }
 0x9b6   : > { %4511 = vtanh.f32 %v2770_v28  ;;  %v2774_v34 = vmul.f32 0.7978846, %v2766_v30  ;;  %v2776_v40 = vmul.f32 0.7978846, %v2768_v31  ;;  %v4457_v25 = vld [vmem:[%s5313_s8 + $0x144] ss:$8 sps:$4 sm:$0xff]  }
 0x9b7   : > { %4513 = vtanh.f32 %v2772_v29  ;;  %v2775_v41 = vmul.f32 0.7978846, %v2767_v35  ;;  %v2777_v42 = vmul.f32 0.7978846, %v2769_v38  ;;  %v4455_v26 = vld [vmem:[%s5313_s8 + $0x140] ss:$8 sps:$4 sm:$0xff]  }
 0x9b8   : > { %4515 = vtanh.f32 %v2771_v32  ;;  %v4460_v27 = vld [vmem:[%s5313_s8 + $0x154] ss:$8 sps:$4 sm:$0xff]   ;;  %v4458_v28 = vld [vmem:[%s5313_s8 + $0x150] ss:$8 sps:$4 sm:$0xff]   ;;  %v4463_v29 = vld [vmem:[%s5313_s8 + $0x164] ss:$8 sps:$4 sm:$0xff]  }
 0x9b9   : > { %4517 = vtanh.f32 %v2773_v33  ;;  %v4461_v30 = vld [vmem:[%s5313_s8 + $0x160] ss:$8 sps:$4 sm:$0xff]   ;;  %v4466_v31 = vld [vmem:[%s5313_s8 + $0x174] ss:$8 sps:$4 sm:$0xff]   ;;  %v4464_v32 = vld [vmem:[%s5313_s8 + $0x170] ss:$8 sps:$4 sm:$0xff]  }
 0x9ba   : > { %4519 = vtanh.f32 %v2774_v34  ;;  %v4469_v33 = vld [vmem:[%s5313_s8 + $0x184] ss:$8 sps:$4 sm:$0xff]   ;;  %v4467_v35 = vld [vmem:[%s5313_s8 + $0x180] ss:$8 sps:$4 sm:$0xff]   ;;  %v4472_v38 = vld [vmem:[%s5313_s8 + $0x194] ss:$8 sps:$4 sm:$0xff]  }
 0x9bb   : > { %4521 = vtanh.f32 %v2776_v40  ;;  %v4470_v34 = vld [vmem:[%s5313_s8 + $0x190] ss:$8 sps:$4 sm:$0xff]   ;;  %v4475_v40 = vld [vmem:[%s5313_s8 + $0x1a4] ss:$8 sps:$4 sm:$0xff]  }
 0x9bc   : > { %4523 = vtanh.f32 %v2775_v41  ;;  %v4473_v41 = vld [vmem:[%s5313_s8 + $0x1a0] ss:$8 sps:$4 sm:$0xff]  }
 0x9bd   : > { %4525 = vtanh.f32 %v2777_v42  ;;  %v4478_v42 = vld [vmem:[%s5313_s8 + $0x1b4] ss:$8 sps:$4 sm:$0xff]  }
 0x9c0   : > { %v4512_v43 = vpop.eup %4511 }
 0x9c1   : > { %v4514_v44 = vpop.eup %4513  ;;  %v2786_v45 = vadd.f32 1.0, %v4512_v43  ;;  %v4476_v43 = vld [vmem:[%s5313_s8 + $0x1b0] ss:$8 sps:$4 sm:$0xff]  }
 0x9c2   : > { %v4516_v46 = vpop.eup %4515  ;;  %v2788_v49 = vadd.f32 1.0, %v4514_v44  ;;  %v4481_v44 = vld [vmem:[%s5313_s8 + $0x1c4] ss:$8 sps:$4 sm:$0xff]  }
 0x9c3   : > { %v4518_v50 = vpop.eup %4517  ;;  %v2787_v55 = vadd.f32 1.0, %v4516_v46  ;;  %v2794_v58 = vmul.f32 0.5, %v2786_v45  ;;  %v4479_v45 = vld [vmem:[%s5313_s8 + $0x1c0] ss:$8 sps:$4 sm:$0xff]   ;;  %v4484_v46 = vld [vmem:[%s5313_s8 + $0x1d4] ss:$8 sps:$4 sm:$0xff]  }
 0x9c4   : > { %v4520_v56 = vpop.eup %4519  ;;  %v2789_v51 = vadd.f32 1.0, %v4518_v50  ;;  %v2796_v61 = vmul.f32 0.5, %v2788_v49  ;;  %v4482_v49 = vld [vmem:[%s5313_s8 + $0x1d0] ss:$8 sps:$4 sm:$0xff]   ;;  %v4487_v50 = vld [vmem:[%s5313_s8 + $0x1e4] ss:$8 sps:$4 sm:$0xff]  }
 0x9c5   : > { %v4522_v36 = vpop.eup %4521  ;;  %v2790_v59 = vadd.f32 1.0, %v4520_v56  ;;  %v2795_v8 = vmul.f32 0.5, %v2787_v55  ;;  %v2802_v12 = vmul.f32 %v2794_v58, %v5664_v47  ;;  %v4485_v55 = vld [vmem:[%s5313_s8 + $0x1e0] ss:$8 sps:$4 sm:$0xff]   ;;  %v4490_v56 = vld [vmem:[%s5313_s8 + $0x1f4] ss:$8 sps:$4 sm:$0xff]  }
 0x9c6   : > { %v4524_v60 = vpop.eup %4523  ;;  %v2792_v5 = vadd.f32 1.0, %v4522_v36  ;;  %v2797_v11 = vmul.f32 0.5, %v2789_v51  ;;  %v5715_v15 = vmul.f32 %v2796_v61, %v5666_v48  ;;  %v4488_v51 = vld [vmem:[%s5313_s8 + $0x1f0] ss:$8 sps:$4 sm:$0xff]   ;;  %v2878_v36 = vld [vmem:[%s843_s2] sm:$0x3] }
 0x9c7   : > { %v4526_v6 = vpop.eup %4525  ;;  %v2798_v7 = vmul.f32 0.5, %v2790_v59  ;;  %v2791_v4 = vadd.f32 1.0, %v4524_v60  ;;  %v2803_v18 = vmul.f32 %v2795_v8, %v5668_v53  ;;  %v4446_v53 = vld [vmem:[%s5313_s8 + $0x110] ss:$8 sps:$4 sm:$0xff]   ;;  %v2883_v58 = vrot.slane %v2878_v36, %v5431_v37 }
 0x9c8   : > { %v2800_v9 = vmul.f32 0.5, %v2792_v5  ;;  %v2793_v10 = vadd.f32 1.0, %v4526_v6  ;;  %v2805_v47 = vmul.f32 %v2797_v11, %v5670_v54  ;;  %v4451_v54 = vld [vmem:[%s5313_s8 + $0x124] ss:$8 sps:$4 sm:$0xff]   ;;  %v2887_v59 = vrot.slane %v2878_v36, %v5435_v39 }
 0x9c9   : > { %v2806_v13 = vmul.f32 %v2798_v7, %v5676_v52  ;;  %v2799_v14 = vmul.f32 0.5, %v2791_v4 }
 0x9ca   : > { %v5718_v16 = vmul.f32 %v2800_v9, %v5678_v57  ;;  %v2801_v17 = vmul.f32 0.5, %v2793_v10  ;;  %v4443_v57 = vld [vmem:[%s5313_s8 + $0x100] ss:$8 sps:$4 sm:$0xff]  }
 0x9cb   : > { %v2807_v19 = vmul.f32 %v2799_v14, %v5684_v62  ;;  %v2810_v20 = vpack.c.bf16 %v2806_v13, %v2802_v12  ;;  %v4449_v62 = vld [vmem:[%s5313_s8 + $0x120] ss:$8 sps:$4 sm:$0xff]  }
 0x9cc   : > { %v2809_v52 = vmul.f32 %v2801_v17, %v5686_v3  ;;  %v2812_v48 = vpack.c.bf16 %v5718_v16, %v5715_v15  ;;  %v4454_v3 = vld [vmem:[%s5313_s8 + $0x134] ss:$8 sps:$4 sm:$0xff]  }
 0x9cd   : > { %v2811_v21 = vpack.c.bf16 %v2807_v19, %v2803_v18 }
 0x9ce   : > { %v2813_v22 = vpack.c.bf16 %v2809_v52, %v2805_v47 }
 0x9cf   : > { %3242 = vmatprep.mubr.bf16.mxu0 %v2811_v21 }
 0x9d0   : > { %3243 = vmatmul.mubr.bf16.vlgmr.msra.gmra.mrb[16].mxu0 %v2810_v20 }
 0x9d1   : > { %3254 = vmatpush1.bf16.msra.mxu0 %v4443_v57  ;;  %3285 = vmatprep.mubr.bf16.mxu0 %v2813_v22 }
 0x9d2   : > { %3255 = vmatprep.subr.bf16.mxu0 %v4448_v23 }
 0x9d5   : > { %3256 = vmatpush1.bf16.msra.mxu0 %v4446_v53 }
 0x9d6   : > { %3257 = vmatprep.subr.bf16.mxu0 %v4451_v54 }
 0x9d9   : > { %3258 = vmatpush1.bf16.msra.mxu0 %v4449_v62 }
 0x9da   : > { %3259 = vmatprep.subr.bf16.mxu0 %v4454_v3 }
 0x9dd   : > { %3260 = vmatpush1.bf16.msra.mxu0 %v4452_v24  ;;  %v3300_v24 = vld [vmem:[%s847_s30] sm:$0x3] }
 0x9de   : > { %3261 = vmatprep.subr.bf16.mxu0 %v4457_v25  ;;  %v3301_v25 = vld [vmem:[%s851_s24] sm:$0x3] }
 0x9e1   : > { %3262 = vmatpush1.bf16.msra.mxu0 %v4455_v26  ;;  %v3338_v26 = vrot.slane %v3300_v24, %v5431_v37 }
 0x9e2   : > { %3263 = vmatprep.subr.bf16.mxu0 %v4460_v27  ;;  %v3342_v27 = vrot.slane %v3300_v24, %v5435_v39 }
 0x9e5   : > { %3264 = vmatpush1.bf16.msra.mxu0 %v4458_v28 }
 0x9e6   : > { %3265 = vmatprep.subr.bf16.mxu0 %v4463_v29  ;;  %v3353_v29 = vrot.slane %v3301_v25, %v5431_v37 }
 0x9e9   : > { %3266 = vmatpush1.bf16.msra.mxu0 %v4461_v30  ;;  %v3357_v30 = vrot.slane %v3301_v25, %v5435_v39 }
 0x9ea   : > { %3267 = vmatprep.subr.bf16.mxu0 %v4466_v31 }
 0x9ed   : > { %3268 = vmatpush1.bf16.msra.mxu0 %v4464_v32 }
 0x9ee   : > { %3269 = vmatprep.subr.bf16.mxu0 %v4469_v33 }
 0x9f1   : > { %3270 = vmatpush1.bf16.msra.mxu0 %v4467_v35 }
 0x9f2   : > { %3271 = vmatprep.subr.bf16.mxu0 %v4472_v38 }
 0x9f5   : > { %3272 = vmatpush1.bf16.msra.mxu0 %v4470_v34 }
 0x9f6   : > { %3273 = vmatprep.subr.bf16.mxu0 %v4475_v40 }
 0x9f9   : > { %3274 = vmatpush1.bf16.msra.mxu0 %v4473_v41 }
 0x9fa   : > { %3275 = vmatprep.subr.bf16.mxu0 %v4478_v42 }
 0x9fd   : > { %3276 = vmatpush1.bf16.msra.mxu0 %v4476_v43 }
 0x9fe   : > { %3277 = vmatprep.subr.bf16.mxu0 %v4481_v44 }
 0xa01   : > { %3278 = vmatpush1.bf16.msra.mxu0 %v4479_v45 }
 0xa02   : > { %3279 = vmatprep.subr.bf16.mxu0 %v4484_v46 }
 0xa05   : > { %3280 = vmatpush1.bf16.msra.mxu0 %v4482_v49 }
 0xa06   : > { %3281 = vmatprep.subr.bf16.mxu0 %v4487_v50 }
 0xa09   : > { %3282 = vmatpush1.bf16.msra.mxu0 %v4485_v55 }
 0xa0a   : > { %3283 = vmatprep.subr.bf16.mxu0 %v4490_v56 }
 0xa0d   : > { %3284 = vmatpush1.bf16.msra.mxu0 %v4488_v51 }
 0xa10   : > { %3286 = vmatmul.mubr.bf16.vlgmr.msra.gmra.mrb[16].mxu0 %v2812_v48 }
 0xae3   : > { %v3287_v60 = vpop.f32.mrb[16].mxu0 }
 0xae4   : > { %v3975_v61 = vadd.f32 %v3287_v60, %v2883_v58  ;;  %v3289_v5 = vpop.f32.mrb[17].mxu0 }
 0xae5   : > { %v3976_v6 = vadd.f32 %v3289_v5, %v2887_v59  ;;  %v3291_v7 = vpop.f32.mrb[18].mxu0 }
 0xae6   : > { %v3296_v4 = vadd.f32 %v3975_v61, %v5617_v1  ;;  %v3977_v8 = vadd.f32 %v3291_v7, %v2883_v58  ;;  %v3293_v9 = vpop.f32.mrb[19].mxu0 }
 0xae7   : > { %v3297_v10 = vadd.f32 %v3976_v6, %v5613_v63  ;;  %v3978_v11 = vadd.f32 %v3293_v9, %v2887_v59 }
 0xae8   : > { %v3298_v12 = vadd.f32 %v3977_v8, %v5619_v2 }
 0xae9   : > { %v3299_v13 = vadd.f32 %v3978_v11, %v5615_v0  ;;  %v3302_v14 = vadd.f32 %v3297_v10, %v3296_v4 }
 0xaeb   : > { %3303 = vadd.xlane.f32.xlu0 %v3302_v14  ;;  %v3305_v15 = vadd.f32 %v3299_v13, %v3298_v12 }
 0xaed   : > { %3306 = vadd.xlane.f32.xlu1 %v3305_v15 }
 0xb78   : > { %v3304_v16 = vpop.xlane.xlu0 %3303 }
 0xb79   : > { %v3308_v17 = vmul.f32 0.00390625, %v3304_v16 }
 0xb7a   : > { %v3307_v18 = vpop.xlane.xlu1 %3306 }
 0xb7b   : > { %v3310_v19 = vsub.f32 %v3296_v4, %v3308_v17  ;;  %v3311_v20 = vsub.f32 %v3297_v10, %v3308_v17  ;;  %v3309_v47 = vmul.f32 0.00390625, %v3307_v18 }
 0xb7d   : > { %v3312_v1 = vsub.f32 %v3298_v12, %v3309_v47  ;;  %v3313_v52 = vsub.f32 %v3299_v13, %v3309_v47  ;;  %v3314_v48 = vmul.f32 %v3310_v19, %v3310_v19  ;;  %v3315_v63 = vmul.f32 %v3311_v20, %v3311_v20 }
 0xb7f   : > { %v3318_v21 = vadd.f32 %v3315_v63, %v3314_v48  ;;  %v3316_v2 = vmul.f32 %v3312_v1, %v3312_v1  ;;  %v3317_v57 = vmul.f32 %v3313_v52, %v3313_v52 }
 0xb81   : > { %3319 = vadd.xlane.f32.xlu0 %v3318_v21  ;;  %v3321_v0 = vadd.f32 %v3317_v57, %v3316_v2 }
 0xb83   : > { %3322 = vadd.xlane.f32.xlu1 %v3321_v0 }
 0xc0e   : > { %v3320_v22 = vpop.xlane.xlu0 %3319 }
 0xc0f   : > { %v3324_v23 = vmul.f32 0.00390625, %v3320_v22 }
 0xc10   : > { %v3323_v53 = vpop.xlane.xlu1 %3322 }
 0xc11   : > { %v3326_v54 = vadd.f32 1e-05, %v3324_v23  ;;  %v3325_v62 = vmul.f32 0.00390625, %v3323_v53 }
 0xc13   : > { %4527 = vrsqrt.f32 %v3326_v54  ;;  %v3327_v3 = vadd.f32 1e-05, %v3325_v62 }
 0xc15   : > { %4529 = vrsqrt.f32 %v3327_v3 }
 0xc1d   : > { %v4528_v28 = vpop.eup %4527 }
 0xc1e   : > { %v3330_v31 = vmul.f32 %v4528_v28, %v3310_v19  ;;  %v3331_v32 = vmul.f32 %v4528_v28, %v3311_v20 }
 0xc1f   : > { %v4530_v33 = vpop.eup %4529 }
 0xc20   : > { %v3345_v35 = vmul.f32 %v3338_v26, %v3330_v31  ;;  %v3346_v38 = vmul.f32 %v3342_v27, %v3331_v32  ;;  %v3332_v34 = vmul.f32 %v4530_v33, %v3312_v1  ;;  %v3333_v40 = vmul.f32 %v4530_v33, %v3313_v52  ;;  %3371 = sbr.rel (%p3931_p13) target bundleno = 3113 (0xc29), region = 128 }
 0xc22   : > { %v3360_v41 = vadd.f32 %v3353_v29, %v3345_v35  ;;  %v3361_v42 = vadd.f32 %v3357_v30, %v3346_v38  ;;  %v3347_v43 = vmul.f32 %v3338_v26, %v3332_v34  ;;  %v3348_v44 = vmul.f32 %v3342_v27, %v3333_v40 }
 0xc24   : > { %3364 = vst [vmem:[#allocation2] sm:$0xff] %v3360_v41  ;;  %3365 = vst [vmem:[#allocation2 + $0x8] sm:$0xff] %v3361_v42  ;;  %v3362_v45 = vadd.f32 %v3353_v29, %v3347_v43  ;;  %v3363_v46 = vadd.f32 %v3357_v30, %v3348_v44  ;;  %v3941_v37 = vpack.c.bf16 (!%p3931_p13), %v3361_v42, %v3360_v41 }
 0xc26   : > { %3366 = vst [vmem:[#allocation2 + $0x10] sm:$0xff] %v3362_v45  ;;  %3367 = vst [vmem:[#allocation2 + $0x18] sm:$0xff] %v3363_v46  ;;  %v3942_v39 = vpack.c.bf16 (!%p3931_p13), %v3363_v46, %v3362_v45 }
 0xc27   : > { %3384 = vst [vmem:[#allocation16] sm:$0xff] %v3941_v37 }
 0xc28   : > { %3385 = vst [vmem:[#allocation16 + $0x8] sm:$0xff] %v3942_v39 }
 0xc29 PF: > { %p4050_p3 = scmp.eq.s32.totalorder %s4975_s28, 1  ;;  %s4863_s16 = smov [#allocation16]  }
 0xc2a   : > { %s3392_s24 = sshll.u32 %s4863_s16, 4  ;;  %s3393_s24 = int_to_ptr.vmem [resolvable:$true] %s3392_s24 }
 0xc2b   : > { %s4767_s30 = scalar_lea.vmem %s3393_s24, 256  ;;  %p4774_p8 = scmp.lt.s32.totalorder %s3393_s24, %s3393_s24 }
 0xc2c   : > { %p4768_p7 = scmp.ne.s32.totalorder %s3393_s24, %s4767_s30  ;;  %p4775_p9 = scmp.lt.s32.totalorder %s4767_s30, %s4767_s30 }
 0xc2e   : > { %p4769_p2 = pnand %p4768_p7, %p4050_p3  ;;  %p4776_p10 = por %p4775_p9, %p4774_p8 }
 0xc30   : > { %p4770_p5 = pneg %p4769_p2 }
 0xc32   : > { %p4777_p1 = pnand %p4776_p10, %p4770_p5 }
 0xc34   : > { %4780 = shalt.err (!%p4777_p1)
}
 0xc35   : > { %s5934_s26 = sld [smem:[#allocation40_spill]] }
 0xc3b   : > { %s5935_s5 = smov %s5934_s26  ;;  %s4781_s20 = scalar_lea.hbm %s5934_s26, 256 }
 0xc3c   : > { %p4782_p4 = scmp.ne.s32.totalorder %s5935_s5, %s4781_s20  ;;  %p4787_p12 = scmp.lt.u32.totalorder %s4781_s20, %s5935_s5 }
 0xc3e   : > { %p4783_p11 = pnand %p4782_p4, %p4050_p3 }
 0xc40   : > { %p4784_p6 = pneg %p4783_p11 }
 0xc42   : > { %p4789_p0 = pnand %p4787_p12, %p4784_p6 }
 0xc44   : > { %4792 = shalt.err (!%p4789_p0)
}
 0xc45   : > { %s4864_s27 = smov 128   ;;  %s4865_s9 = smov 8  }
 0xc46   : > { %4012 = dma.vmem_to_hbm [thread:$0]  (%p4050_p3), %s3393_s24, 256, %s5935_s5, [#allocation6], %s4864_s27, %s4864_s27, %s4865_s9  }
 0xc47   : > { %4826 = dma.done.wait (%p4050_p3), [#allocation6], 256  }
 0xc48   : > { %4828 = vsyncadd (%p4050_p3), [#allocation6], 4294967040 }
 0xc49 PF: > { %s5936_s27 = sld [smem:[#allocation23_spill]]  ;;  %s5937_s21 = sld [smem:[#allocation22_spill]] }
 0xc4a   : > { %s5938_s26 = sld [smem:[#allocation24_spill]]  ;;  %s5939_s24 = smov %s4835_s25 }
 0xc4f   : > { %p28_p13 = scmp.ge.s32.totalorder %s5936_s27, 4   ;;  %s5940_s25 = smov %s5937_s21 }
 0xc51   :  { %30 = sbr.rel (!%p28_p13) target bundleno = 22 (0x16), region = 205 }
 0xc58   :  { %3408 = vsyncpa [#allocation5], 1 }
 0xc59   :  { %3410 = vsyncpa [#allocation5 + $0x1], 1 }
 0xc5a   :  { %3411 = vsyncpa [#allocation8], 1 }
 0xc5b   :  { %3412 = vsyncpa [#allocation11], 1 }
 0xc5c   :  { %3413 = vsyncpa [#allocation6], 1 }
 0xc5d   :  { %3415 = vsyncpa [#allocation6 + $0x1], 1 }

</bundles_post_ra>
